<compile_context>
chip_gen: v7x
topology: tpu7x:2x2x1
jax: 0.10.0
libtpu: 0.0.40
codegen_flags: <defaults>
</compile_context>

<pallas_src>
import math

import jax
import jax.numpy as jnp
from jax.experimental import pallas as pl
from jax.experimental.pallas import tpu as pltpu

# ---------------- small config (consistent with the module, scaled down) ---
D_MODEL = 128
N_HEADS = 4
D_HEAD = 32
D_MLP = 256
SEQ = 8
BATCH = 2
LN_EPS = 1e-5
INIT_RANGE = 0.02
IGNORE = -100000.0  # reference sets masked scores to this value (not -inf)

HD = N_HEADS * D_HEAD  # 128


def _gelu_new(x):
    # GPT-2 "new" gelu: 0.5*x*(1+tanh(sqrt(2/pi)*(x + 0.044715*x^3)))
    return 0.5 * x * (1.0 + jnp.tanh(
        math.sqrt(2.0 / math.pi) * (x + 0.044715 * x ** 3)))


def _layernorm(x, w, b, eps):
    # w, b are lane-dense (1, D) rows -> broadcast along sublanes for free.
    mean = jnp.mean(x, axis=-1, keepdims=True)
    var = jnp.mean((x - mean) ** 2, axis=-1, keepdims=True)  # unbiased=False
    return (x - mean) * jax.lax.rsqrt(var + eps) * w + b


def transformer_block_kernel(
    x_ref,
    ln1w_ref, ln1b_ref,
    wqkv_ref, bqkv_ref,
    wo_ref, bo_ref,
    ln2w_ref, ln2b_ref,
    win_ref, bin_ref, wout_ref, bout_ref,
    o_ref,
):
    x = x_ref[0]  # (S, D) fp32, one batch element
    S = x.shape[0]

    # ---------------- ln1 ----------------
    ln1 = _layernorm(x, ln1w_ref[...], ln1b_ref[...], LN_EPS)

    # ---------------- fused QKV projection (one lane-dense MXU matmul) ------
    # (S, D) @ (D, 3*H*Dh) -> (S, 3*H*Dh) = (8, 384), unmasked lane-dense stores.
    qkv = jnp.dot(ln1, wqkv_ref[...],
                  preferred_element_type=jnp.float32) + bqkv_ref[...]
    q = qkv[:, 0 * HD:1 * HD]      # (S, H*Dh) = (8, 128), static slices
    k = qkv[:, 1 * HD:2 * HD]
    v = qkv[:, 2 * HD:3 * HD]

    # Per-head layout only for the scores / softmax step.
    q_h = q.reshape(S, N_HEADS, D_HEAD)
    k_h = k.reshape(S, N_HEADS, D_HEAD)
    v_h = v.reshape(S, N_HEADS, D_HEAD)

    # scores[h, q, k] = q . k / sqrt(d_head)
    scores = jnp.einsum('qhe,khe->hqk', q_h, k_h,
                        preferred_element_type=jnp.float32)
    scores = scores * (1.0 / math.sqrt(D_HEAD))

    # causal mask: key position > query position gets set to IGNORE
    row = jax.lax.broadcasted_iota(jnp.int32, (S, S), 0)  # query pos
    col = jax.lax.broadcasted_iota(jnp.int32, (S, S), 1)  # key pos
    scores = jnp.where((col > row)[None, :, :], IGNORE, scores)

    # softmax over key axis; normalization reciprocal on the EUP slot
    m = jnp.max(scores, axis=-1, keepdims=True)
    e = jnp.exp(scores - m)
    denom = jnp.sum(e, axis=-1, keepdims=True)
    probs = e * pl.reciprocal(denom, approx=True)

    # weighted average of values, back to lane-dense (S, H*Dh)
    weighted = jnp.einsum('hqk,khe->qhe', probs, v_h,
                          preferred_element_type=jnp.float32)
    weighted_flat = weighted.reshape(S, HD)  # (8, 128)

    # output projection: one lane-dense (8,128) @ (128,128) matmul
    attn_out = jnp.dot(weighted_flat, wo_ref[...],
                       preferred_element_type=jnp.float32) + bo_ref[...]

    resid_mid = x + attn_out

    # ---------------- ln2 + MLP ----------------
    ln2 = _layernorm(resid_mid, ln2w_ref[...], ln2b_ref[...], LN_EPS)

    pre = jnp.dot(ln2, win_ref[...],
                  preferred_element_type=jnp.float32) + bin_ref[...]
    act = _gelu_new(pre)
    mlp_out = jnp.dot(act, wout_ref[...],
                      preferred_element_type=jnp.float32) + bout_ref[...]

    o_ref[0] = resid_mid + mlp_out


def transformer_block(x, params):
    B, S, D = x.shape
    H, _, Dh = params['W_Q'].shape
    M = params['W_in'].shape[1]
    hd = H * Dh

    # ---- wrapper-side layout plumbing (lane-dense weights / biases) --------
    # Fused QKV weight: (H, D, Dh) -> (D, H*Dh) per projection, concat -> (D, 3*H*Dh)
    w_qkv = jnp.concatenate([
        jnp.transpose(params['W_Q'], (1, 0, 2)).reshape(D, hd),
        jnp.transpose(params['W_K'], (1, 0, 2)).reshape(D, hd),
        jnp.transpose(params['W_V'], (1, 0, 2)).reshape(D, hd),
    ], axis=1)                                              # (D, 3*H*Dh)
    b_qkv = jnp.concatenate([
        params['b_Q'].reshape(1, hd),
        params['b_K'].reshape(1, hd),
        params['b_V'].reshape(1, hd),
    ], axis=1)                                              # (1, 3*H*Dh)
    w_o = params['W_O'].reshape(hd, D)                      # (H*Dh, D)
    b_o = params['b_O'].reshape(1, D)
    ln1_w = params['ln1_w'].reshape(1, D)
    ln1_b = params['ln1_b'].reshape(1, D)
    ln2_w = params['ln2_w'].reshape(1, D)
    ln2_b = params['ln2_b'].reshape(1, D)
    b_in = params['b_in'].reshape(1, M)
    b_out = params['b_out'].reshape(1, D)

    full = lambda shape: pl.BlockSpec(shape, lambda b: (0,) * len(shape))

    in_specs = [
        pl.BlockSpec((1, S, D), lambda b: (b, 0, 0)),   # x (per-batch block)
        full((1, D)), full((1, D)),                     # ln1 w, b
        full((D, 3 * hd)), full((1, 3 * hd)),           # W_qkv, b_qkv
        full((hd, D)), full((1, D)),                    # W_O (flat), b_O
        full((1, D)), full((1, D)),                     # ln2 w, b
        full((D, M)), full((1, M)),                     # W_in, b_in
        full((M, D)), full((1, D)),                     # W_out, b_out
    ]
    out_spec = pl.BlockSpec((1, S, D), lambda b: (b, 0, 0))

    return pl.pallas_call(
        transformer_block_kernel,
        out_shape=jax.ShapeDtypeStruct((B, S, D), jnp.float32),
        grid_spec=pltpu.PrefetchScalarGridSpec(
            num_scalar_prefetch=0,
            grid=(B,),
            in_specs=in_specs,
            out_specs=out_spec,
        ),
        compiler_params=pltpu.CompilerParams(
            dimension_semantics=("parallel",)),
    )(
        x,
        ln1_w, ln1_b,
        w_qkv, b_qkv,
        w_o, b_o,
        ln2_w, ln2_b,
        params['W_in'], b_in, params['W_out'], b_out,
    )


def init_params(key):
    ks = jax.random.split(key, 6)
    std = INIT_RANGE
    return {
        'ln1_w': jnp.ones((D_MODEL,), jnp.float32),
        'ln1_b': jnp.zeros((D_MODEL,), jnp.float32),
        'W_Q': std * jax.random.normal(ks[0], (N_HEADS, D_MODEL, D_HEAD), jnp.float32),
        'W_K': std * jax.random.normal(ks[1], (N_HEADS, D_MODEL, D_HEAD), jnp.float32),
        'W_V': std * jax.random.normal(ks[2], (N_HEADS, D_MODEL, D_HEAD), jnp.float32),
        'W_O': std * jax.random.normal(ks[3], (N_HEADS, D_HEAD, D_MODEL), jnp.float32),
        'b_Q': jnp.zeros((N_HEADS, D_HEAD), jnp.float32),
        'b_K': jnp.zeros((N_HEADS, D_HEAD), jnp.float32),
        'b_V': jnp.zeros((N_HEADS, D_HEAD), jnp.float32),
        'b_O': jnp.zeros((D_MODEL,), jnp.float32),
        'ln2_w': jnp.ones((D_MODEL,), jnp.float32),
        'ln2_b': jnp.zeros((D_MODEL,), jnp.float32),
        'W_in': std * jax.random.normal(ks[4], (D_MODEL, D_MLP), jnp.float32),
        'b_in': jnp.zeros((D_MLP,), jnp.float32),
        'W_out': std * jax.random.normal(ks[5], (D_MLP, D_MODEL), jnp.float32),
        'b_out': jnp.zeros((D_MODEL,), jnp.float32),
    }


def reference_block(x, p):
    """Plain-JAX reference (uses the original per-head params) for checking."""
    def ln(v, w, b):
        mean = v.mean(-1, keepdims=True)
        var = ((v - mean) ** 2).mean(-1, keepdims=True)
        return (v - mean) / jnp.sqrt(var + LN_EPS) * w + b

    ln1 = ln(x, p['ln1_w'], p['ln1_b'])
    q = jnp.einsum('bsd,hdk->bshk', ln1, p['W_Q']) + p['b_Q']
    k = jnp.einsum('bsd,hdk->bshk', ln1, p['W_K']) + p['b_K']
    v = jnp.einsum('bsd,hdk->bshk', ln1, p['W_V']) + p['b_V']
    scores = jnp.einsum('bkhe,bqhe->bhqk', k, q) / math.sqrt(D_HEAD)
    S = x.shape[1]
    mask = jnp.triu(jnp.ones((S, S), bool), k=1)
    scores = jnp.where(mask, IGNORE, scores)
    probs = jax.nn.softmax(scores, axis=-1)
    weighted = jnp.einsum('bkhe,bhqk->bqhe', v, probs)
    attn_out = jnp.einsum('bqhe,hed->bqd', weighted, p['W_O']) + p['b_O']
    resid_mid = x + attn_out
    ln2 = ln(resid_mid, p['ln2_w'], p['ln2_b'])
    pre = jnp.einsum('bsd,dm->bsm', ln2, p['W_in']) + p['b_in']
    act = _gelu_new(pre)
    mlp_out = jnp.einsum('bsm,md->bsd', act, p['W_out']) + p['b_out']
    return resid_mid + mlp_out


if __name__ == "__main__":
    key = jax.random.PRNGKey(0)
    kx, kp = jax.random.split(key)
    x = jax.random.normal(kx, (BATCH, SEQ, D_MODEL), jnp.float32)
    params = init_params(kp)

    out = transformer_block(x, params)
    out = jax.block_until_ready(out)

    ref = reference_block(x, params)
    assert out.shape == (BATCH, SEQ, D_MODEL)
    # Tolerance slightly relaxed vs 1e-4 because the softmax normalization now
    # uses the EUP approximate reciprocal (pl.reciprocal(approx=True)).
    assert jnp.allclose(out, ref, rtol=1e-3, atol=1e-3), "mismatch vs reference"

    print("KERNEL_OK")
</pallas_src>

<mosaic_0001>
module attributes {stable_mosaic.version = 11 : i64} {
  func.func @transformer_block_kernel(%arg0: i32, %arg1: memref<1x8x128xf32, #tpu.memory_space<vmem>>, %arg2: memref<1x128xf32, #tpu.memory_space<vmem>>, %arg3: memref<1x128xf32, #tpu.memory_space<vmem>>, %arg4: memref<128x384xf32, #tpu.memory_space<vmem>>, %arg5: memref<1x384xf32, #tpu.memory_space<vmem>>, %arg6: memref<128x128xf32, #tpu.memory_space<vmem>>, %arg7: memref<1x128xf32, #tpu.memory_space<vmem>>, %arg8: memref<1x128xf32, #tpu.memory_space<vmem>>, %arg9: memref<1x128xf32, #tpu.memory_space<vmem>>, %arg10: memref<128x256xf32, #tpu.memory_space<vmem>>, %arg11: memref<1x256xf32, #tpu.memory_space<vmem>>, %arg12: memref<256x128xf32, #tpu.memory_space<vmem>>, %arg13: memref<1x128xf32, #tpu.memory_space<vmem>>, %arg14: memref<1x8x128xf32, #tpu.memory_space<vmem>>) attributes {dimension_semantics = [#tpu.dimension_semantics<parallel>], iteration_bounds = array<i64: 2>, scalar_prefetch = 0 : i64, scratch_operands = 0 : i64, tpu.core_type = #tpu.core_type<tc>, window_params = [{transform_indices = @transform_0, window_bounds = array<i64: 1, 8, 128>}, {pipeline_mode = #tpu.pipeline_mode<synchronous>, transform_indices = @transform_1, window_bounds = array<i64: 1, 128>}, {pipeline_mode = #tpu.pipeline_mode<synchronous>, transform_indices = @transform_2, window_bounds = array<i64: 1, 128>}, {pipeline_mode = #tpu.pipeline_mode<synchronous>, transform_indices = @transform_3, window_bounds = array<i64: 128, 384>}, {pipeline_mode = #tpu.pipeline_mode<synchronous>, transform_indices = @transform_4, window_bounds = array<i64: 1, 384>}, {pipeline_mode = #tpu.pipeline_mode<synchronous>, transform_indices = @transform_5, window_bounds = array<i64: 128, 128>}, {pipeline_mode = #tpu.pipeline_mode<synchronous>, transform_indices = @transform_6, window_bounds = array<i64: 1, 128>}, {pipeline_mode = #tpu.pipeline_mode<synchronous>, transform_indices = @transform_7, window_bounds = array<i64: 1, 128>}, {pipeline_mode = #tpu.pipeline_mode<synchronous>, transform_indices = @transform_8, window_bounds = array<i64: 1, 128>}, {pipeline_mode = #tpu.pipeline_mode<synchronous>, transform_indices = @transform_9, window_bounds = array<i64: 128, 256>}, {pipeline_mode = #tpu.pipeline_mode<synchronous>, transform_indices = @transform_10, window_bounds = array<i64: 1, 256>}, {pipeline_mode = #tpu.pipeline_mode<synchronous>, transform_indices = @transform_11, window_bounds = array<i64: 256, 128>}, {pipeline_mode = #tpu.pipeline_mode<synchronous>, transform_indices = @transform_12, window_bounds = array<i64: 1, 128>}, {transform_indices = @transform_13, window_bounds = array<i64: 1, 8, 128>}]} {
    %c0 = arith.constant 0 : index
    %c0_0 = arith.constant 0 : index
    %c0_1 = arith.constant 0 : index
    %0 = vector.load %arg1[%c0, %c0_0, %c0_1] : memref<1x8x128xf32, #tpu.memory_space<vmem>>, vector<1x8x128xf32>
    %1 = vector.shape_cast %0 : vector<1x8x128xf32> to vector<8x128xf32>
    %c0_2 = arith.constant 0 : index
    %c0_3 = arith.constant 0 : index
    %2 = vector.load %arg2[%c0_2, %c0_3] : memref<1x128xf32, #tpu.memory_space<vmem>>, vector<1x128xf32>
    %c0_4 = arith.constant 0 : index
    %c0_5 = arith.constant 0 : index
    %3 = vector.load %arg3[%c0_4, %c0_5] : memref<1x128xf32, #tpu.memory_space<vmem>>, vector<1x128xf32>
    %cst = arith.constant dense<0.000000e+00> : vector<8xf32>
    %4 = vector.multi_reduction <add>, %1, %cst [1] : vector<8x128xf32> to vector<8xf32>
    %5 = vector.shape_cast %4 : vector<8xf32> to vector<8x1xf32>
    %cst_6 = arith.constant 1.280000e+02 : f32
    %6 = vector.broadcast %cst_6 : f32 to vector<8x1xf32>
    %7 = arith.divf %5, %6 : vector<8x1xf32>
    %8 = vector.broadcast %7 : vector<8x1xf32> to vector<8x128xf32>
    %9 = arith.subf %1, %8 : vector<8x128xf32>
    %10 = arith.mulf %9, %9 : vector<8x128xf32>
    %cst_7 = arith.constant dense<0.000000e+00> : vector<8xf32>
    %11 = vector.multi_reduction <add>, %10, %cst_7 [1] : vector<8x128xf32> to vector<8xf32>
    %12 = vector.shape_cast %11 : vector<8xf32> to vector<8x1xf32>
    %cst_8 = arith.constant 1.280000e+02 : f32
    %13 = vector.broadcast %cst_8 : f32 to vector<8x1xf32>
    %14 = arith.divf %12, %13 : vector<8x1xf32>
    %15 = vector.broadcast %7 : vector<8x1xf32> to vector<8x128xf32>
    %16 = arith.subf %1, %15 : vector<8x128xf32>
    %cst_9 = arith.constant 9.99999974E-6 : f32
    %17 = vector.broadcast %cst_9 : f32 to vector<8x1xf32>
    %18 = arith.addf %14, %17 : vector<8x1xf32>
    %19 = math.rsqrt %18 : vector<8x1xf32>
    %20 = vector.broadcast %19 : vector<8x1xf32> to vector<8x128xf32>
    %21 = arith.mulf %16, %20 : vector<8x128xf32>
    %22 = vector.broadcast %2 : vector<1x128xf32> to vector<8x128xf32>
    %23 = arith.mulf %21, %22 : vector<8x128xf32>
    %24 = vector.broadcast %3 : vector<1x128xf32> to vector<8x128xf32>
    %25 = arith.addf %23, %24 : vector<8x128xf32>
    %c0_10 = arith.constant 0 : index
    %c0_11 = arith.constant 0 : index
    %26 = vector.load %arg4[%c0_10, %c0_11] : memref<128x384xf32, #tpu.memory_space<vmem>>, vector<128x384xf32>
    %cst_12 = arith.constant dense<0.000000e+00> : vector<8x384xf32>
    %27 = tpu.matmul %25, %26, %cst_12 {dimension_numbers = #tpu.dot_dimension_numbers<[1], [0], [0], [1], [0, 0, 1, 1], [], []>} : vector<8x128xf32>, vector<128x384xf32>, vector<8x384xf32> -> vector<8x384xf32>
    %c0_13 = arith.constant 0 : index
    %c0_14 = arith.constant 0 : index
    %28 = vector.load %arg5[%c0_13, %c0_14] : memref<1x384xf32, #tpu.memory_space<vmem>>, vector<1x384xf32>
    %29 = vector.broadcast %28 : vector<1x384xf32> to vector<8x384xf32>
    %30 = arith.addf %27, %29 : vector<8x384xf32>
    %31 = vector.extract_strided_slice %30 {offsets = [0, 0], sizes = [8, 128], strides = [1, 1]} : vector<8x384xf32> to vector<8x128xf32>
    %32 = vector.extract_strided_slice %30 {offsets = [0, 128], sizes = [8, 128], strides = [1, 1]} : vector<8x384xf32> to vector<8x128xf32>
    %33 = vector.extract_strided_slice %30 {offsets = [0, 256], sizes = [8, 128], strides = [1, 1]} : vector<8x384xf32> to vector<8x128xf32>
    %34 = vector.shape_cast %31 : vector<8x128xf32> to vector<8x4x32xf32>
    %35 = vector.shape_cast %32 : vector<8x128xf32> to vector<8x4x32xf32>
    %36 = vector.shape_cast %33 : vector<8x128xf32> to vector<8x4x32xf32>
    "tpu.trace_start"() <{level = 10 : i32, message = "qhe,khe->hqk"}> : () -> ()
    %cst_15 = arith.constant dense<0.000000e+00> : vector<4x8x8xf32>
    %37 = tpu.matmul %34, %35, %cst_15 {dimension_numbers = #tpu.dot_dimension_numbers<[2], [2], [0], [0], [0, 1, 0, 0, 1, 0], [1], [1]>} : vector<8x4x32xf32>, vector<8x4x32xf32>, vector<4x8x8xf32> -> vector<4x8x8xf32>
    "tpu.trace_stop"() : () -> ()
    %cst_16 = arith.constant 0.176776692 : f32
    %38 = vector.broadcast %cst_16 : f32 to vector<4x8x8xf32>
    %39 = arith.mulf %37, %38 : vector<4x8x8xf32>
    %40 = tpu.iota {dimensions = array<i32: 0>} : vector<8x8xi32>
    %41 = tpu.iota {dimensions = array<i32: 1>} : vector<8x8xi32>
    %42 = arith.cmpi sgt, %41, %40 : vector<8x8xi32>
    %43 = vector.shape_cast %42 : vector<8x8xi1> to vector<1x8x8xi1>
    %cst_17 = arith.constant -1.000000e+05 : f32
    %44 = vector.shape_cast %43 : vector<1x8x8xi1> to vector<1x8x8xi1>
    %45 = vector.broadcast %44 : vector<1x8x8xi1> to vector<4x8x8xi1>
    %46 = vector.broadcast %cst_17 : f32 to vector<4x8x8xf32>
    %47 = arith.select %45, %46, %39 : vector<4x8x8xi1>, vector<4x8x8xf32>
    %cst_18 = arith.constant dense<0xFF800000> : vector<4x8xf32>
    %48 = vector.multi_reduction <maximumf>, %47, %cst_18 [2] : vector<4x8x8xf32> to vector<4x8xf32>
    %49 = vector.shape_cast %48 : vector<4x8xf32> to vector<4x8x1xf32>
    %50 = vector.broadcast %49 : vector<4x8x1xf32> to vector<4x8x8xf32>
    %51 = arith.subf %47, %50 : vector<4x8x8xf32>
    %52 = math.exp %51 : vector<4x8x8xf32>
    %cst_19 = arith.constant dense<0.000000e+00> : vector<4x8xf32>
    %53 = vector.multi_reduction <add>, %52, %cst_19 [2] : vector<4x8x8xf32> to vector<4x8xf32>
    %54 = vector.shape_cast %53 : vector<4x8xf32> to vector<4x8x1xf32>
    %55 = tpu.reciprocal %54 {approx = true} : vector<4x8x1xf32> -> vector<4x8x1xf32>
    %56 = vector.broadcast %55 : vector<4x8x1xf32> to vector<4x8x8xf32>
    %57 = arith.mulf %52, %56 : vector<4x8x8xf32>
    "tpu.trace_start"() <{level = 10 : i32, message = "hqk,khe->qhe"}> : () -> ()
    %cst_20 = arith.constant dense<0.000000e+00> : vector<4x32x8xf32>
    %58 = tpu.matmul %36, %57, %cst_20 {dimension_numbers = #tpu.dot_dimension_numbers<[0], [2], [2], [1], [0, 1, 0, 2, 1, 1], [1], [0]>} : vector<8x4x32xf32>, vector<4x8x8xf32>, vector<4x32x8xf32> -> vector<4x32x8xf32>
    %59 = tpu.transpose %58, [2, 0, 1] : vector<4x32x8xf32> -> vector<8x4x32xf32>
    "tpu.trace_stop"() : () -> ()
    %60 = vector.shape_cast %59 : vector<8x4x32xf32> to vector<8x128xf32>
    %c0_21 = arith.constant 0 : index
    %c0_22 = arith.constant 0 : index
    %61 = vector.load %arg6[%c0_21, %c0_22] : memref<128x128xf32, #tpu.memory_space<vmem>>, vector<128x128xf32>
    %cst_23 = arith.constant dense<0.000000e+00> : vector<8x128xf32>
    %62 = tpu.matmul %60, %61, %cst_23 {dimension_numbers = #tpu.dot_dimension_numbers<[1], [0], [0], [1], [0, 0, 1, 1], [], []>} : vector<8x128xf32>, vector<128x128xf32>, vector<8x128xf32> -> vector<8x128xf32>
    %c0_24 = arith.constant 0 : index
    %c0_25 = arith.constant 0 : index
    %63 = vector.load %arg7[%c0_24, %c0_25] : memref<1x128xf32, #tpu.memory_space<vmem>>, vector<1x128xf32>
    %64 = vector.broadcast %63 : vector<1x128xf32> to vector<8x128xf32>
    %65 = arith.addf %62, %64 : vector<8x128xf32>
    %66 = arith.addf %1, %65 : vector<8x128xf32>
    %c0_26 = arith.constant 0 : index
    %c0_27 = arith.constant 0 : index
    %67 = vector.load %arg8[%c0_26, %c0_27] : memref<1x128xf32, #tpu.memory_space<vmem>>, vector<1x128xf32>
    %c0_28 = arith.constant 0 : index
    %c0_29 = arith.constant 0 : index
    %68 = vector.load %arg9[%c0_28, %c0_29] : memref<1x128xf32, #tpu.memory_space<vmem>>, vector<1x128xf32>
    %cst_30 = arith.constant dense<0.000000e+00> : vector<8xf32>
    %69 = vector.multi_reduction <add>, %66, %cst_30 [1] : vector<8x128xf32> to vector<8xf32>
    %70 = vector.shape_cast %69 : vector<8xf32> to vector<8x1xf32>
    %cst_31 = arith.constant 1.280000e+02 : f32
    %71 = vector.broadcast %cst_31 : f32 to vector<8x1xf32>
    %72 = arith.divf %70, %71 : vector<8x1xf32>
    %73 = vector.broadcast %72 : vector<8x1xf32> to vector<8x128xf32>
    %74 = arith.subf %66, %73 : vector<8x128xf32>
    %75 = arith.mulf %74, %74 : vector<8x128xf32>
    %cst_32 = arith.constant dense<0.000000e+00> : vector<8xf32>
    %76 = vector.multi_reduction <add>, %75, %cst_32 [1] : vector<8x128xf32> to vector<8xf32>
    %77 = vector.shape_cast %76 : vector<8xf32> to vector<8x1xf32>
    %cst_33 = arith.constant 1.280000e+02 : f32
    %78 = vector.broadcast %cst_33 : f32 to vector<8x1xf32>
    %79 = arith.divf %77, %78 : vector<8x1xf32>
    %80 = vector.broadcast %72 : vector<8x1xf32> to vector<8x128xf32>
    %81 = arith.subf %66, %80 : vector<8x128xf32>
    %cst_34 = arith.constant 9.99999974E-6 : f32
    %82 = vector.broadcast %cst_34 : f32 to vector<8x1xf32>
    %83 = arith.addf %79, %82 : vector<8x1xf32>
    %84 = math.rsqrt %83 : vector<8x1xf32>
    %85 = vector.broadcast %84 : vector<8x1xf32> to vector<8x128xf32>
    %86 = arith.mulf %81, %85 : vector<8x128xf32>
    %87 = vector.broadcast %67 : vector<1x128xf32> to vector<8x128xf32>
    %88 = arith.mulf %86, %87 : vector<8x128xf32>
    %89 = vector.broadcast %68 : vector<1x128xf32> to vector<8x128xf32>
    %90 = arith.addf %88, %89 : vector<8x128xf32>
    %c0_35 = arith.constant 0 : index
    %c0_36 = arith.constant 0 : index
    %91 = vector.load %arg10[%c0_35, %c0_36] : memref<128x256xf32, #tpu.memory_space<vmem>>, vector<128x256xf32>
    %cst_37 = arith.constant dense<0.000000e+00> : vector<8x256xf32>
    %92 = tpu.matmul %90, %91, %cst_37 {dimension_numbers = #tpu.dot_dimension_numbers<[1], [0], [0], [1], [0, 0, 1, 1], [], []>} : vector<8x128xf32>, vector<128x256xf32>, vector<8x256xf32> -> vector<8x256xf32>
    %c0_38 = arith.constant 0 : index
    %c0_39 = arith.constant 0 : index
    %93 = vector.load %arg11[%c0_38, %c0_39] : memref<1x256xf32, #tpu.memory_space<vmem>>, vector<1x256xf32>
    %94 = vector.broadcast %93 : vector<1x256xf32> to vector<8x256xf32>
    %95 = arith.addf %92, %94 : vector<8x256xf32>
    %cst_40 = arith.constant 5.000000e-01 : f32
    %96 = vector.broadcast %cst_40 : f32 to vector<8x256xf32>
    %97 = arith.mulf %96, %95 : vector<8x256xf32>
    %98 = arith.mulf %95, %95 : vector<8x256xf32>
    %99 = arith.mulf %95, %98 : vector<8x256xf32>
    %cst_41 = arith.constant 4.471500e-02 : f32
    %100 = vector.broadcast %cst_41 : f32 to vector<8x256xf32>
    %101 = arith.mulf %100, %99 : vector<8x256xf32>
    %102 = arith.addf %95, %101 : vector<8x256xf32>
    %cst_42 = arith.constant 0.797884583 : f32
    %103 = vector.broadcast %cst_42 : f32 to vector<8x256xf32>
    %104 = arith.mulf %103, %102 : vector<8x256xf32>
    %105 = math.tanh %104 : vector<8x256xf32>
    %cst_43 = arith.constant 1.000000e+00 : f32
    %106 = vector.broadcast %cst_43 : f32 to vector<8x256xf32>
    %107 = arith.addf %106, %105 : vector<8x256xf32>
    %108 = arith.mulf %97, %107 : vector<8x256xf32>
    %c0_44 = arith.constant 0 : index
    %c0_45 = arith.constant 0 : index
    %109 = vector.load %arg12[%c0_44, %c0_45] : memref<256x128xf32, #tpu.memory_space<vmem>>, vector<256x128xf32>
    %cst_46 = arith.constant dense<0.000000e+00> : vector<8x128xf32>
    %110 = tpu.matmul %108, %109, %cst_46 {dimension_numbers = #tpu.dot_dimension_numbers<[1], [0], [0], [1], [0, 0, 1, 1], [], []>} : vector<8x256xf32>, vector<256x128xf32>, vector<8x128xf32> -> vector<8x128xf32>
    %c0_47 = arith.constant 0 : index
    %c0_48 = arith.constant 0 : index
    %111 = vector.load %arg13[%c0_47, %c0_48] : memref<1x128xf32, #tpu.memory_space<vmem>>, vector<1x128xf32>
    %112 = vector.broadcast %111 : vector<1x128xf32> to vector<8x128xf32>
    %113 = arith.addf %110, %112 : vector<8x128xf32>
    %114 = arith.addf %66, %113 : vector<8x128xf32>
    %c0_49 = arith.constant 0 : index
    %c0_50 = arith.constant 0 : index
    %c0_51 = arith.constant 0 : index
    %115 = vector.load %arg14[%c0_49, %c0_50, %c0_51] : memref<1x8x128xf32, #tpu.memory_space<vmem>>, vector<1x8x128xf32>
    %116 = vector.shape_cast %115 : vector<1x8x128xf32> to vector<8x128xf32>
    %117 = vector.shape_cast %114 : vector<8x128xf32> to vector<1x8x128xf32>
    tpu.vector_store %arg14[%c0_49, %c0_50, %c0_51], %117 {strides = array<i32>} : memref<1x8x128xf32, #tpu.memory_space<vmem>>, vector<1x8x128xf32>,
    return
  }
  func.func @transform_0(%arg0: i32) -> (i32, i32, i32) {
    %c0_i32 = arith.constant 0 : i32
    %c0_i32_0 = arith.constant 0 : i32
    %c0_i32_1 = arith.constant 0 : i32
    return %arg0, %c0_i32, %c0_i32_0 : i32, i32, i32
  }
  func.func @transform_1(%arg0: i32) -> (i32, i32) {
    %c0_i32 = arith.constant 0 : i32
    %c0_i32_0 = arith.constant 0 : i32
    %c0_i32_1 = arith.constant 0 : i32
    return %c0_i32, %c0_i32_0 : i32, i32
  }
  func.func @transform_2(%arg0: i32) -> (i32, i32) {
    %c0_i32 = arith.constant 0 : i32
    %c0_i32_0 = arith.constant 0 : i32
    %c0_i32_1 = arith.constant 0 : i32
    return %c0_i32, %c0_i32_0 : i32, i32
  }
  func.func @transform_3(%arg0: i32) -> (i32, i32) {
    %c0_i32 = arith.constant 0 : i32
    %c0_i32_0 = arith.constant 0 : i32
    %c0_i32_1 = arith.constant 0 : i32
    return %c0_i32, %c0_i32_0 : i32, i32
  }
  func.func @transform_4(%arg0: i32) -> (i32, i32) {
    %c0_i32 = arith.constant 0 : i32
    %c0_i32_0 = arith.constant 0 : i32
    %c0_i32_1 = arith.constant 0 : i32
    return %c0_i32, %c0_i32_0 : i32, i32
  }
  func.func @transform_5(%arg0: i32) -> (i32, i32) {
    %c0_i32 = arith.constant 0 : i32
    %c0_i32_0 = arith.constant 0 : i32
    %c0_i32_1 = arith.constant 0 : i32
    return %c0_i32, %c0_i32_0 : i32, i32
  }
  func.func @transform_6(%arg0: i32) -> (i32, i32) {
    %c0_i32 = arith.constant 0 : i32
    %c0_i32_0 = arith.constant 0 : i32
    %c0_i32_1 = arith.constant 0 : i32
    return %c0_i32, %c0_i32_0 : i32, i32
  }
  func.func @transform_7(%arg0: i32) -> (i32, i32) {
    %c0_i32 = arith.constant 0 : i32
    %c0_i32_0 = arith.constant 0 : i32
    %c0_i32_1 = arith.constant 0 : i32
    return %c0_i32, %c0_i32_0 : i32, i32
  }
  func.func @transform_8(%arg0: i32) -> (i32, i32) {
    %c0_i32 = arith.constant 0 : i32
    %c0_i32_0 = arith.constant 0 : i32
    %c0_i32_1 = arith.constant 0 : i32
    return %c0_i32, %c0_i32_0 : i32, i32
  }
  func.func @transform_9(%arg0: i32) -> (i32, i32) {
    %c0_i32 = arith.constant 0 : i32
    %c0_i32_0 = arith.constant 0 : i32
    %c0_i32_1 = arith.constant 0 : i32
    return %c0_i32, %c0_i32_0 : i32, i32
  }
  func.func @transform_10(%arg0: i32) -> (i32, i32) {
    %c0_i32 = arith.constant 0 : i32
    %c0_i32_0 = arith.constant 0 : i32
    %c0_i32_1 = arith.constant 0 : i32
    return %c0_i32, %c0_i32_0 : i32, i32
  }
  func.func @transform_11(%arg0: i32) -> (i32, i32) {
    %c0_i32 = arith.constant 0 : i32
    %c0_i32_0 = arith.constant 0 : i32
    %c0_i32_1 = arith.constant 0 : i32
    return %c0_i32, %c0_i32_0 : i32, i32
  }
  func.func @transform_12(%arg0: i32) -> (i32, i32) {
    %c0_i32 = arith.constant 0 : i32
    %c0_i32_0 = arith.constant 0 : i32
    %c0_i32_1 = arith.constant 0 : i32
    return %c0_i32, %c0_i32_0 : i32, i32
  }
  func.func @transform_13(%arg0: i32) -> (i32, i32, i32) {
    %c0_i32 = arith.constant 0 : i32
    %c0_i32_0 = arith.constant 0 : i32
    %c0_i32_1 = arith.constant 0 : i32
    return %arg0, %c0_i32, %c0_i32_0 : i32, i32, i32
  }
}

</mosaic_0001>

<bundles_post_ra>
// kernel: tpu_custom_call.1
= control target key start
LH: loop header
LB: loop body
LE: loop exit
PB: predicated region body
PF: predicated region fallthrough
CT: control target
= control target key end

     0   :  { %s3919_s0 = inlined_call_operand.hbm [shape: f32[2,8,128], index: 0, kind: input, shape index: {}]   ;;  %s3920_s1 = inlined_call_operand.vmem [shape: f32[1,128], index: 1, kind: input, shape index: {}]   ;;  %s3921_s2 = inlined_call_operand.vmem [shape: f32[1,128], index: 2, kind: input, shape index: {}]   ;;  %s3922_s3 = inlined_call_operand.hbm [shape: f32[128,384], index: 3, kind: input, shape index: {}]   ;;  %s3923_s4 = inlined_call_operand.vmem [shape: f32[1,384], index: 4, kind: input, shape index: {}]   ;;  %s3924_s5 = inlined_call_operand.hbm [shape: f32[128,128], index: 5, kind: input, shape index: {}]   ;;  %s3925_s6 = inlined_call_operand.vmem [shape: f32[1,128], index: 6, kind: input, shape index: {}]   ;;  %s3926_s7 = inlined_call_operand.vmem [shape: f32[1,128], index: 7, kind: input, shape index: {}]   ;;  %s3927_s8 = inlined_call_operand.vmem [shape: f32[1,128], index: 8, kind: input, shape index: {}]   ;;  %s3928_s9 = inlined_call_operand.hbm [shape: f32[128,256], index: 9, kind: input, shape index: {}]   ;;  %s3929_s10 = inlined_call_operand.vmem [shape: f32[1,256], index: 10, kind: input, shape index: {}]   ;;  %s3930_s11 = inlined_call_operand.hbm [shape: f32[256,128], index: 11, kind: input, shape index: {}]   ;;  %s3931_s12 = inlined_call_operand.vmem [shape: f32[1,128], index: 12, kind: input, shape index: {}]   ;;  %s3932_s13 = inlined_call_operand.hbm [shape: f32[2,8,128], index: 13, kind: output, shape index: {}]  }
   0x1   :  { %3937 = sst [smem:[#allocation16_spill]] %s3922_s3 }
   0x2   :  { %3938 = sst [smem:[#allocation17_spill]] %s3926_s7 }
   0x3   :  { %3939 = sst [smem:[#allocation18_spill]] %s3927_s8 }
   0x4   :  { %3940 = sst [smem:[#allocation19_spill]] %s3929_s10 }
   0x5   :  { %3941 = sst [smem:[#allocation20_spill]] %s3931_s12 }
   0x6   :  { %3942 = sst [smem:[#allocation21_spill]] %s3932_s13 }
   0x7   :  { %18 = vsyncpa [#allocation3], 0 }
   0x8   :  { %20 = vsyncpa [#allocation3 + $0x1], 0 }
   0x9   :  { %21 = vsyncpa [#allocation6], 0 }
   0xa   :  { %22 = vsyncpa [#allocation9], 0 }
   0xb   :  { %23 = vsyncpa [#allocation4], 0 }
   0xc   :  { %25 = vsyncpa [#allocation4 + $0x1], 0  ;;  %s3479_s25 = smov 0   ;;  %s3481_s26 = smov 0  }
   0xd   :  { %s3483_s27 = smov 0   ;;  %s3485_s28 = smov 0  }
   0xe LB: > { %s3389_s29 = smov [#allocation5]   ;;  %s3500_s14 = sadd.s32 4294967295, %s3387_s28   ;;  %s3387_s28 = sphi %s3485_s28, %s3969_s28   ;;  %s3383_s27 = sphi %s3483_s27, %s3968_s27   ;;  %s3379_s26 = sphi %s3481_s26, %s3967_s26   ;;  %s3375_s25 = sphi %s3479_s25, %s3966_s25  }
   0xf   : > { %s358_s30 = sshll.u32 %s3389_s29, 4  ;;  %p2550_p0 = scmp.ge.s32.totalorder %s3387_s28, 1  ;;  %s3505_s30 = int_to_ptr.vmem [resolvable:$true] %s358_s30 }
  0x10   : > { %p3934_p1 = scmp.eq.s32.totalorder %s3500_s14, 0  ;;  %p340_p2 = scmp.lt.s32.totalorder %s3387_s28, 3 }
  0x11   : > { %s3390_s16 = smov [#allocation8]   ;;  %s3391_s19 = smov [#allocation7]  }
  0x12   : > { %p3507_p3 = pnand %p2550_p0, %p340_p2  ;;  %s396_s17 = sshll.u32 %s3390_s16, 4  ;;  %s3520_s17 = int_to_ptr.vmem [resolvable:$true] %s396_s17 }
  0x13   : > { %s3522_s20 = sshll.u32 %s3391_s19, 4  ;;  %s3945_s3 = sld [smem:[#allocation16_spill]]  ;;  %s375_s20 = int_to_ptr.vmem [resolvable:$true] %s3522_s20 }
  0x14   : > { %s3943_s15 = scalar_select %p3507_p3, 1, 0 }
  0x15   : > { %p3044_p5 = pneg %p3507_p3 }
  0x17   : > { %p3516_p6 = pnand %p3044_p5, %p3934_p1 }
  0x19   : > { %s3171_s23 = scalar_lea.hbm %s3945_s3, 6144  ;;  %p3532_p8 = pneg %p3516_p6 }
  0x1a   : > { %p3172_p7 = scmp.ne.s32.totalorder %s3945_s3, %s3171_s23  ;;  %p3178_p11 = scmp.lt.u32.totalorder %s3171_s23, %s3945_s3 }
  0x1c   : > { %p3174_p9 = pnand %p3532_p8, %p3172_p7 }
  0x1e   : > { %p3175_p10 = pneg %p3174_p9 }
  0x20   : > { %p3180_p12 = pnand %p3178_p11, %p3175_p10 }
  0x22   : > { %3183 = shalt.err (!%p3180_p12)
}
  0x23   : > { %s3184_s21 = scalar_lea.vmem %s3505_s30, 6144  ;;  %p3192_p5 = scmp.lt.s32.totalorder %s3505_s30, %s3505_s30 }
  0x24   : > { %p3185_p13 = scmp.ne.s32.totalorder %s3505_s30, %s3184_s21  ;;  %p3193_p4 = scmp.lt.s32.totalorder %s3184_s21, %s3184_s21 }
  0x26   : > { %p3187_p0 = pnand %p3185_p13, %p3532_p8  ;;  %p3194_p7 = por %p3193_p4, %p3192_p5 }
  0x28   : > { %p3188_p2 = pneg %p3187_p0 }
  0x2a   : > { %p3195_p9 = pnand %p3194_p7, %p3188_p2 }
  0x2c   : > { %3198 = shalt.err (!%p3195_p9)
}
  0x2d   : > { %s3392_s22 = smov 384   ;;  %s3393_s13 = smov 24  }
  0x2e   : > { %3047 = dma.hbm_to_vmem [thread:$0]  (!%p3516_p6), %s3945_s3, 6144, %s3505_s30, [#allocation6], %s3392_s22, %s3392_s22, %s3393_s13  }
  0x2f   : > { %s3199_s12 = scalar_lea.hbm %s3928_s9, 4096 }
  0x30   : > { %p3200_p4 = scmp.ne.s32.totalorder %s3928_s9, %s3199_s12  ;;  %p3206_p12 = scmp.lt.u32.totalorder %s3199_s12, %s3928_s9 }
  0x32   : > { %p3202_p10 = pnand %p3200_p4, %p3532_p8 }
  0x34   : > { %p3203_p11 = pneg %p3202_p10 }
  0x36   : > { %p3208_p13 = pnand %p3206_p12, %p3203_p11 }
  0x38   : > { %3211 = shalt.err (!%p3208_p13)
}
  0x39   : > { %s3212_s30 = scalar_lea.vmem %s3520_s17, 4096  ;;  %p3220_p7 = scmp.lt.s32.totalorder %s3520_s17, %s3520_s17 }
  0x3a   : > { %p3213_p0 = scmp.ne.s32.totalorder %s3520_s17, %s3212_s30  ;;  %p3221_p9 = scmp.lt.s32.totalorder %s3212_s30, %s3212_s30 }
  0x3c   : > { %p3215_p2 = pnand %p3213_p0, %p3532_p8  ;;  %p3222_p4 = por %p3221_p9, %p3220_p7 }
  0x3e   : > { %p3216_p5 = pneg %p3215_p2 }
  0x40   : > { %p3223_p10 = pnand %p3222_p4, %p3216_p5 }
  0x42   : > { %3226 = shalt.err (!%p3223_p10)
}
  0x43   : > { %s3394_s8 = smov 256   ;;  %s3395_s7 = smov 16  }
  0x44   : > { %3053 = dma.hbm_to_vmem [thread:$0]  (!%p3516_p6), %s3928_s9, 4096, %s3520_s17, [#allocation9], %s3394_s8, %s3394_s8, %s3395_s7  }
  0x45   : > { %s3227_s23 = scalar_lea.hbm %s3924_s5, 2048 }
  0x46   : > { %p3228_p11 = scmp.ne.s32.totalorder %s3924_s5, %s3227_s23  ;;  %p3234_p0 = scmp.lt.u32.totalorder %s3227_s23, %s3924_s5 }
  0x48   : > { %p3230_p12 = pnand %p3228_p11, %p3532_p8 }
  0x4a   : > { %p3231_p13 = pneg %p3230_p12 }
  0x4c   : > { %p3236_p2 = pnand %p3234_p0, %p3231_p13 }
  0x4e   : > { %3239 = shalt.err (!%p3236_p2)
}
  0x4f   : > { %s3240_s30 = scalar_lea.vmem %s375_s20, 2048  ;;  %p3248_p4 = scmp.lt.s32.totalorder %s375_s20, %s375_s20 }
  0x50   : > { %p3241_p5 = scmp.ne.s32.totalorder %s375_s20, %s3240_s30  ;;  %p3249_p10 = scmp.lt.s32.totalorder %s3240_s30, %s3240_s30 }
  0x52   : > { %p3243_p7 = pnand %p3241_p5, %p3532_p8  ;;  %p3250_p1 = por %p3249_p10, %p3248_p4 }
  0x54   : > { %p3244_p9 = pneg %p3243_p7 }
  0x56   : > { %p3251_p3 = pnand %p3250_p1, %p3244_p9 }
  0x58   : > { %3254 = shalt.err (!%p3251_p3)
}
  0x59   : > { %s3396_s17 = smov 128   ;;  %s3397_s8 = smov 8  }
  0x5a   : > { %3050 = dma.hbm_to_vmem [thread:$0]  (!%p3516_p6), %s3924_s5, 2048, %s375_s20, [#allocation6], %s3396_s17, %s3396_s17, %s3397_s8  }
  0x5b   : > { %s3398_s12 = smov [#allocation10]   ;;  %s3255_s24 = scalar_lea.hbm %s3930_s11, 4096 }
  0x5c   : > { %s412_s22 = sshll.u32 %s3398_s12, 4  ;;  %p3256_p1 = scmp.ne.s32.totalorder %s3930_s11, %s3255_s24  ;;  %s413_s22 = int_to_ptr.vmem [resolvable:$true] %s412_s22 }
  0x5d   : > { %p3262_p12 = scmp.lt.u32.totalorder %s3255_s24, %s3930_s11 }
  0x5e   : > { %p3258_p3 = pnand %p3256_p1, %p3532_p8 }
  0x60   : > { %p3259_p11 = pneg %p3258_p3 }
  0x62   : > { %p3264_p13 = pnand %p3262_p12, %p3259_p11 }
  0x64   : > { %3267 = shalt.err (!%p3264_p13)
}
  0x65   : > { %s3268_s20 = scalar_lea.vmem %s413_s22, 4096  ;;  %p3276_p7 = scmp.lt.s32.totalorder %s413_s22, %s413_s22 }
  0x66   : > { %p3269_p0 = scmp.ne.s32.totalorder %s413_s22, %s3268_s20  ;;  %p3277_p9 = scmp.lt.s32.totalorder %s3268_s20, %s3268_s20 }
  0x68   : > { %p3271_p2 = pnand %p3269_p0, %p3532_p8  ;;  %p3278_p4 = por %p3277_p9, %p3276_p7 }
  0x6a   : > { %p3272_p5 = pneg %p3271_p2 }
  0x6c   : > { %p3279_p10 = pnand %p3278_p4, %p3272_p5 }
  0x6e   : > { %3282 = shalt.err (!%p3279_p10)
}
  0x6f   : > { %3056 = dma.hbm_to_vmem [thread:$0]  (!%p3516_p6), %s3930_s11, 4096, %s413_s22, [#allocation9], %s3396_s17, %s3396_s17, %s3397_s8  }
  0x70   : > { %s2549_s16 = sadd.s32 4294967294, %s3387_s28   ;;  %s3615_s18 = sadd.s32 1, %s3387_s28  }
  0x71   : > { %s35_s12 = ssub.s32 %s3387_s28, %s3615_s18  ;;  %s38_s13 = sadd.s32 1, %s3383_s27 }
  0x72   : > { %p36_p8 = scmp.eq.s32.totalorder %s35_s12, 0  ;;  %p45_p1 = scmp.ne.s32.totalorder %s3383_s27, %s3379_s26 }
  0x73   : > { %p46_p3 = scmp.eq.s32.totalorder %s3387_s28, 0  ;;  %p51_p11 = scmp.ne.s32.totalorder %s3379_s26, %s3375_s25 }
  0x74   : > { %s3626_s23 = scalar_select %p36_p8, %s3383_s27, %s38_s13  }
  0x75   : > { %p3628_p12 = por %p46_p3, %p45_p1  ;;  %p3948_p13 = scmp.eq.s32.totalorder %s3500_s14, 0 }
  0x76   : > { %p327_p0 = scmp.eq.s32.totalorder %s3500_s14, 1  ;;  %p333_p2 = scmp.eq.s32.totalorder %s2549_s16, 1 }
  0x77   : > { %p3634_p6 = por %p3948_p13, %p51_p11  ;;  %p3069_p5 = scmp.lt.s32.totalorder %s3387_s28, 2 }
  0x78   : > { %s429_s8 = sand.u32 1, %s3383_s27   ;;  %p3641_p7 = por %p327_p0, %p45_p1 }
  0x79   : > { %p3645_p9 = por %p333_p2, %p51_p11  ;;  %s2556_s19 = sshll.u32 %s429_s8, 3 }
  0x7a   : > { %s3950_s22 = scalar_select %p3641_p7, 1, 0 }
  0x7b   : > { %s3951_s29 = scalar_select %p3645_p9, 1, 0 }
  0x7c   : > { %s2557_s21 = sshll.u32 %s3387_s28, 7  ;;  %s433_s10 = scalar_lea.vmem [#allocation2], %s2556_s19 }
  0x7d   : > { %s3653_s7 = scalar_lea.hbm %s3919_s0, %s2557_s21  ;;  %s440_s16 = sshll.u32 %s433_s10, 4  ;;  %s3655_s16 = int_to_ptr.vmem [resolvable:$true] %s440_s16 }
  0x7e   : > { %p3659_p4 = pnand %p3069_p5, %p3628_p12  ;;  %s430_s13 = scalar_lea.sflag [#allocation3], %s429_s8 }
  0x7f   : > { %s3283_s3 = scalar_lea.hbm %s3653_s7, 128  ;;  %s3288_s30 = scalar_lea.hbm %s3919_s0, 256 }
  0x80   : > { %p3284_p10 = scmp.ne.s32.totalorder %s3653_s7, %s3283_s3  ;;  %p3285_p8 = pneg %p3659_p4 }
  0x81   : > { %p3289_p11 = scmp.lt.u32.totalorder %s3653_s7, %s3919_s0  ;;  %p3290_p12 = scmp.lt.u32.totalorder %s3288_s30, %s3283_s3 }
  0x82   : > { %p3286_p1 = pnand %p3285_p8, %p3284_p10  ;;  %p3292_p0 = scmp.lt.u32.totalorder %s3283_s3, %s3653_s7 }
  0x83   : > { %p3291_p13 = por %p3290_p12, %p3289_p11 }
  0x84   : > { %p3287_p3 = pneg %p3286_p1 }
  0x85   : > { %p3293_p2 = por %p3292_p0, %p3291_p13 }
  0x87   : > { %p3294_p5 = pnand %p3293_p2, %p3287_p3 }
  0x89   : > { %3297 = shalt.err (!%p3294_p5)
}
  0x8a   : > { %s3298_s8 = scalar_lea.vmem %s3655_s16, 128  ;;  %s3399_s10 = smov [#allocation2]  }
  0x8b   : > { %p3299_p10 = scmp.ne.s32.totalorder %s3655_s16, %s3298_s8  ;;  %s3303_s19 = sshll.u32 %s3399_s10, 4  ;;  %s3304_s19 = int_to_ptr.vmem [resolvable:$false] %s3303_s19 }
  0x8c   : > { %s3305_s21 = scalar_lea.vmem %s3304_s19, 256  ;;  %p3306_p7 = scmp.lt.s32.totalorder %s3655_s16, %s3304_s19 }
  0x8d   : > { %p3301_p1 = pnand %p3299_p10, %p3285_p8  ;;  %p3307_p11 = scmp.lt.s32.totalorder %s3305_s21, %s3298_s8 }
  0x8f   : > { %p3302_p9 = pneg %p3301_p1  ;;  %p3308_p12 = por %p3307_p11, %p3306_p7 }
  0x91   : > { %p3309_p13 = pnand %p3308_p12, %p3302_p9 }
  0x93   : > { %3312 = shalt.err (!%p3309_p13)
}
  0x94   : > { %3060 = dma.hbm_to_vmem [thread:$0]  (!%p3659_p4), %s3653_s7, 128, %s3655_s16, %s430_s13  }
  0x95   : > { %p3953_p3 = scmp.ne.s32.totalorder %s3943_s15, 0 }
  0x96   : > { %s3691_s3 = sand.u32 (!%p3953_p3), 1, %s3379_s26  }
  0x97   : > { %449 = sbr.rel (%p3953_p3) target bundleno = 3030 (0xbd6), region = 72  ;;  %s2559_s30 = sshll.u32 (!%p3953_p3), %s3691_s3, 3 }
  0x98   : > { %s452_s24 = scalar_lea.sflag (!%p3953_p3), [#allocation3], %s3691_s3  ;;  %s455_s20 = scalar_lea.vmem (!%p3953_p3), [#allocation2], %s2559_s30 }
  0x9e   : > { %3358 = dma.done.wait (%p3634_p6), %s452_s24, 128  }
  0x9f   : > { %3360 = vsyncadd (%p3634_p6), %s452_s24, 4294967168  ;;  %p3954_p7 = scmp.eq.s32.totalorder %s3500_s14, 0 }
  0xa1   : > { %3362 = dma.done.wait (%p3954_p7), [#allocation6], 8192   ;;  %p3955_p9 = pmov %p3954_p7 }
  0xa2   : > { %p3956_p4 = pmov %p3954_p7 }
  0xa3   : > { %3364 = vsyncadd (%p3955_p9), [#allocation6], 4294959104 }
  0xa4   : > { %3366 = dma.done.wait (%p3956_p4), [#allocation9], 8192   ;;  %p3957_p8 = pmov %p3956_p4 }
  0xa5   : > { %v3709_v0 = vld [vmem:[%s455_s20] sm:$0xff]  ;;  %v544_v1 = vld [vmem:[#allocation5 + $0x8] sm:$0xff]  ;;  %v547_v2 = vld [vmem:[#allocation5 + $0x20] sm:$0xff]  ;;  %v3400_v5 = vmov 0.0|0.0   ;;  %v3401_v57 = vmov 0.0   ;;  %vm3402_vm0 = vmmov 0  }
  0xa6   : > { %3368 = vsyncadd (%p3957_p8), [#allocation9], 4294959104  ;;  %517 = vadd.xlane.f32.xlu0 %v3709_v0  ;;  %v543_v3 = vld [vmem:[#allocation5] sm:$0xff]  ;;  %v2856_v4 = vpack.c.bf16 %v547_v2, %v544_v1  ;;  %2888 = vmatprep.subr.bf16.mxu1 %v3400_v5  ;;  %v546_v6 = vld [vmem:[#allocation5 + $0x18] sm:$0xff]  ;;  %s3403_s8 = smov 32   ;;  %s3404_s10 = smov 96  }
  0xa7   : > { %v545_v7 = vld [vmem:[#allocation5 + $0x10] sm:$0xff]  ;;  %v548_v8 = vld [vmem:[#allocation5 + $0x28] sm:$0xff]  ;;  %v2858_v9 = vpack.c.bf16 %v546_v6, %v543_v3  ;;  %v550_v11 = vld [vmem:[#allocation5 + $0x38] sm:$0xff]  ;;  %672 = vmatprep.mubr.f32.mxu0 %v3401_v57  ;;  %2742 = vmatprep.mubr.msk.f32.mxu1 %vm3402_vm0, %v3401_v57  ;;  %s3405_s19 = smov 64   ;;  %vm904_vm1 = vcmask 261120   ;;  %vm1208_vm3 = vcmask 64512  }
  0xa8   : > { %v2889_v10 = vpack.c.bf16 %v548_v8, %v545_v7  ;;  %v553_v12 = vld [vmem:[#allocation5 + $0x50] sm:$0xff]  ;;  %2857 = vmatprep.subr.bf16.mxu0 %v2856_v4  ;;  %v552_v15 = vld [vmem:[#allocation5 + $0x48] sm:$0xff]  ;;  %v551_v16 = vld [vmem:[#allocation5 + $0x40] sm:$0xff]  ;;  %vm2058_vm4 = vcmask 523264   ;;  %vm2060_vm5 = vcmask 785408   ;;  %s3958_s17 = sld [smem:[#allocation17_spill]] }
  0xa9   : > { %v549_v13 = vld [vmem:[#allocation5 + $0x30] sm:$0xff]  ;;  %v2860_v14 = vpack.c.bf16 %v553_v12, %v550_v11  ;;  %v554_v17 = vld [vmem:[#allocation5 + $0x58] sm:$0xff]  ;;  %2859 = vmatpush1.bf16.msra.mxu0 %v2858_v9  ;;  %v556_v20 = vld [vmem:[#allocation5 + $0x68] sm:$0xff]  ;;  %s3959_s12 = sld [smem:[#allocation18_spill]]  ;;  %s3961_s24 = sld [smem:[#allocation20_spill]] }
  0xaa   : > { %2890 = vmatpush3.bf16.msra.mxu1 %v2889_v10  ;;  %v2862_v18 = vpack.c.bf16 %v552_v15, %v549_v13  ;;  %v2892_v19 = vpack.c.bf16 %v554_v17, %v551_v16  ;;  %v559_v21 = vld [vmem:[#allocation5 + $0x80] sm:$0xff]  ;;  %v558_v24 = vld [vmem:[#allocation5 + $0x78] sm:$0xff]  ;;  %v557_v25 = vld [vmem:[#allocation5 + $0x70] sm:$0xff]  ;;  %s2598_s20 = sshll.u32 %s3500_s14, 7  ;;  %s513_s15 = scalar_lea.vmem [#allocation11], %s2559_s30 }
  0xab   : > { %v555_v22 = vld [vmem:[#allocation5 + $0x60] sm:$0xff]  ;;  %2861 = vmatprep.subr.bf16.mxu0 %v2860_v14  ;;  %2891 = vmatprep.subr.bf16.mxu1 %v3400_v5  ;;  %v2864_v23 = vpack.c.bf16 %v559_v21, %v556_v20  ;;  %v560_v26 = vld [vmem:[#allocation5 + $0x88] sm:$0xff]  ;;  %v562_v33 = vld [vmem:[#allocation5 + $0x98] sm:$0xff]  ;;  %p3963_p0 = scmp.ne.s32.totalorder %s3950_s22, 0  ;;  %s3408_s14 = smov [#allocation11]  }
  0xac   : > { %v2866_v27 = vpack.c.bf16 %v558_v24, %v555_v22  ;;  %v2895_v28 = vpack.c.bf16 %v560_v26, %v557_v25  ;;  %v565_v34 = vld [vmem:[#allocation5 + $0xb0] sm:$0xff]  ;;  %v564_v37 = vld [vmem:[#allocation5 + $0xa8] sm:$0xff]  ;;  %v563_v38 = vld [vmem:[#allocation5 + $0xa0] sm:$0xff]  ;;  %v593_v26 = vlaneseq  ;;  %s3317_s30 = sshll.u32 %s3408_s14, 4  ;;  %s3318_s30 = int_to_ptr.vmem [resolvable:$false] %s3317_s30 }
  0xad   : > { %2863 = vmatpush1.bf16.msra.mxu0 %v2862_v18  ;;  %v2868_v35 = vpack.c.bf16 %v565_v34, %v562_v33  ;;  %v561_v36 = vld [vmem:[#allocation5 + $0x90] sm:$0xff]  ;;  %v566_v40 = vld [vmem:[#allocation5 + $0xb8] sm:$0xff]  ;;  %v568_v42 = vld [vmem:[#allocation5 + $0xc8] sm:$0xff] }
  0xae   : > { %2893 = vmatpush3.bf16.msra.mxu1 %v2892_v19  ;;  %2865 = vmatprep.subr.bf16.mxu0 %v2864_v23  ;;  %v2870_v39 = vpack.c.bf16 %v564_v37, %v561_v36  ;;  %v2898_v41 = vpack.c.bf16 %v566_v40, %v563_v38  ;;  %v571_v43 = vld [vmem:[#allocation5 + $0xe0] sm:$0xff]  ;;  %v570_v46 = vld [vmem:[#allocation5 + $0xd8] sm:$0xff]  ;;  %v569_v47 = vld [vmem:[#allocation5 + $0xd0] sm:$0xff] }
  0xaf   : > { %2894 = vmatprep.subr.bf16.mxu1 %v3400_v5  ;;  %v2872_v44 = vpack.c.bf16 %v571_v43, %v568_v42  ;;  %v567_v45 = vld [vmem:[#allocation5 + $0xc0] sm:$0xff]  ;;  %v572_v49 = vld [vmem:[#allocation5 + $0xe8] sm:$0xff]  ;;  %v574_v50 = vld [vmem:[#allocation5 + $0xf8] sm:$0xff] }
  0xb0   : > { %v2874_v48 = vpack.c.bf16 %v570_v46, %v567_v45  ;;  %v577_v51 = vld [vmem:[#allocation5 + $0x110] sm:$0xff]  ;;  %v2901_v52 = vpack.c.bf16 %v572_v49, %v569_v47  ;;  %v576_v55 = vld [vmem:[#allocation5 + $0x108] sm:$0xff]  ;;  %v575_v56 = vld [vmem:[#allocation5 + $0x100] sm:$0xff] }
  0xb1   : > { %2867 = vmatpush1.bf16.msra.mxu0 %v2866_v27  ;;  %v2876_v53 = vpack.c.bf16 %v577_v51, %v574_v50  ;;  %v573_v54 = vld [vmem:[#allocation5 + $0xf0] sm:$0xff]  ;;  %v578_v59 = vld [vmem:[#allocation5 + $0x118] sm:$0xff]  ;;  %v580_v60 = vld [vmem:[#allocation5 + $0x128] sm:$0xff]  ;;  %v3739_v27 = vshrl.u32 %v593_v26, 7 }
  0xb2   : > { %2896 = vmatpush3.bf16.msra.mxu1 %v2895_v28  ;;  %2869 = vmatprep.subr.bf16.mxu0 %v2868_v35  ;;  %v2878_v58 = vpack.c.bf16 %v576_v55, %v573_v54  ;;  %v583_v61 = vld [vmem:[#allocation5 + $0x140] sm:$0xff]  ;;  %v2904_v62 = vpack.c.bf16 %v578_v59, %v575_v56  ;;  %v582_v2 = vld [vmem:[#allocation5 + $0x138] sm:$0xff]  ;;  %v581_v3 = vld [vmem:[#allocation5 + $0x130] sm:$0xff] }
  0xb3   : > { %2897 = vmatprep.subr.bf16.mxu1 %v3400_v5  ;;  %v2880_v63 = vpack.c.bf16 %v583_v61, %v580_v60  ;;  %v579_v1 = vld [vmem:[#allocation5 + $0x120] sm:$0xff]  ;;  %v584_v4 = vld [vmem:[#allocation5 + $0x148] sm:$0xff]  ;;  %v586_v6 = vld [vmem:[#allocation5 + $0x158] sm:$0xff]  ;;  %v599_v28 = vsub.s32 1, %v3739_v27 }
  0xb4   : > { %v589_v7 = vld [vmem:[#allocation5 + $0x170] sm:$0xff]  ;;  %v2882_v8 = vpack.c.bf16 %v582_v2, %v579_v1  ;;  %v2907_v9 = vpack.c.bf16 %v584_v4, %v581_v3  ;;  %v588_v12 = vld [vmem:[#allocation5 + $0x168] sm:$0xff]  ;;  %v587_v13 = vld [vmem:[#allocation5 + $0x160] sm:$0xff] }
  0xb5   : > { %2871 = vmatpush1.bf16.msra.mxu0 %v2870_v39  ;;  %v2884_v10 = vpack.c.bf16 %v589_v7, %v586_v6  ;;  %v585_v11 = vld [vmem:[#allocation5 + $0x150] sm:$0xff]  ;;  %v590_v14 = vld [vmem:[#allocation5 + $0x178] sm:$0xff] }
  0xb6   : > { %2899 = vmatpush3.bf16.msra.mxu1 %v2898_v41  ;;  %2873 = vmatprep.subr.bf16.mxu0 %v2872_v44  ;;  %v2886_v15 = vpack.c.bf16 %v588_v12, %v585_v11  ;;  %v2910_v16 = vpack.c.bf16 %v590_v14, %v587_v13  ;;  %v2565_v21 = vld [vmem:[%s3920_s1] ss:$0 sm:$0xff]  ;;  %v1200_v13 = vand.u32 127, %v593_v26 }
  0xb7   : > { %2900 = vmatprep.subr.bf16.mxu1 %v3400_v5  ;;  %v2566_v23 = vld [vmem:[%s3921_s2] ss:$0 sm:$0xff] }
  0xb8   : > { %vm1201_vm2 = vcmp.gt.s32.totalorder %v1200_v13, %v3739_v27 }
  0xb9   : > { %2875 = vmatpush1.bf16.msra.mxu0 %v2874_v48 }
  0xba   : > { %2902 = vmatpush3.bf16.msra.mxu1 %v2901_v52  ;;  %2877 = vmatprep.subr.bf16.mxu0 %v2876_v53 }
  0xbb   : > { %2903 = vmatprep.subr.bf16.mxu1 %v3400_v5 }
  0xbd   : > { %2879 = vmatpush1.bf16.msra.mxu0 %v2878_v58 }
  0xbe   : > { %2905 = vmatpush3.bf16.msra.mxu1 %v2904_v62  ;;  %2881 = vmatprep.subr.bf16.mxu0 %v2880_v63 }
  0xbf   : > { %2906 = vmatprep.subr.bf16.mxu1 %v3400_v5 }
  0xc1   : > { %2883 = vmatpush1.bf16.msra.mxu0 %v2882_v8 }
  0xc2   : > { %2908 = vmatpush3.bf16.msra.mxu1 %v2907_v9  ;;  %2885 = vmatprep.subr.bf16.mxu0 %v2884_v10 }
  0xc3   : > { %2909 = vmatprep.subr.bf16.mxu1 %v3400_v5 }
  0xc5   : > { %2887 = vmatpush1.bf16.msra.mxu0 %v2886_v15 }
  0xc6   : > { %2911 = vmatpush3.bf16.msra.mxu1 %v2910_v16 }
  0xc7   : > { %2912 = vmatprep.subr.bf16.mxu1 %v3400_v5 }
 0x133   : > { %v518_v29 = vpop.xlane.xlu0 %517 }
 0x134   : > { %v520_v30 = vmul.f32 0.0078125, %v518_v29  ;;  %v3745_v29 = vld [vmem:[%s3923_s4] sm:$0x7] }
 0x136   : > { %v3717_v31 = vsub.f32 %v3709_v0, %v520_v30  ;;  %v595_v30 = vsub.s32 0, %v3739_v27 }
 0x138   : > { %v522_v32 = vmul.f32 %v3717_v31, %v3717_v31  ;;  %v596_v36 = vrot.slane %v3745_v29, %v595_v30 }
 0x13a   : > { %523 = vadd.xlane.f32.xlu0 %v522_v32 }
 0x1c7   : > { %v524_v17 = vpop.xlane.xlu0 %523 }
 0x1c8   : > { %v525_v18 = vmul.f32 0.0078125, %v524_v17 }
 0x1ca   : > { %v526_v19 = vadd.f32 1e-05, %v525_v18 }
 0x1cc   : > { %3147 = vrsqrt.f32 %v526_v19 }
 0x1d6   : > { %v3148_v20 = vpop.eup %3147 }
 0x1d7   : > { %v528_v22 = vmul.f32 %v3148_v20, %v3717_v31  ;;  %v600_v31 = vrot.slane %v3745_v29, %v599_v28 }
 0x1d9   : > { %v535_v24 = vmul.f32 %v2565_v21, %v528_v22 }
 0x1db   : > { %v542_v25 = vadd.f32 %v2566_v23, %v535_v24 }
 0x1dd   : > { %673 = vmatmul.mubr.f32.vlgmr.msra.gmra.mrb[0].mxu0 %v542_v25  ;;  %2743 = vmatmul.mubr.f32.vlgmr.msra.gmra.mrb[0].mxu1 %v542_v25 }
 0x1de   : > { %2753 = vmatprep.mubr.msk.f32.mxu1 %vm3402_vm0, %v3401_v57 }
 0x2b0   : > { %v674_v32 = vpop.f32.mrb[0].mxu0  ;;  %v3751_v33 = vpop.f32.mrb[0].mxu1 }
 0x2b1   : > { %v676_v34 = vpop.f32.mrb[1].mxu0  ;;  %v2744_v35 = vpop.f32.mrb[1].mxu1  ;;  %v675_v38 = vadd.f32 %v674_v32, %v596_v36 }
 0x2b2   : > { %v677_v37 = vadd.f32 %v676_v34, %v600_v31  ;;  %v603_v35 = vsub.s32 2, %v3739_v27 }
 0x2b4   : > { %763 = vrot.lane.b32.xlu0 %v677_v37, %s3403_s8  ;;  %757 = vrot.lane.b32.xlu1 %v677_v37, %s3404_s10 }
 0x2b8   : > { %760 = vrot.lane.b32.xlu1 %v677_v37, %s3405_s19  ;;  %752 = vrot.lane.b32.xlu0 %v675_v38, %s3405_s19 }
 0x2bc   : > { %754 = vrot.lane.b32.xlu0 %v675_v38, %s3403_s8  ;;  %750 = vrot.lane.b32.xlu1 %v675_v38, %s3404_s10 }
 0x326   : > { %v758_v39 = vpop.permute.xlu1 %757  ;;  %v764_v42 = vpop.permute.xlu0 %763 }
 0x327   : > { %v3125_v40 = vpack.i.bf16 %v758_v39, %v677_v37 }
 0x329   : > { %3126 = vxpose.xlu1.b32.start.end [1/1] (short) (narrow) %v3125_v40, 32  ;;  %v604_v40 = vrot.slane %v3745_v29, %v603_v35 }
 0x32a   : > { %v761_v41 = vpop.permute.xlu1 %760  ;;  %v753_v44 = vpop.permute.xlu0 %752 }
 0x32b   : > { %840 = vxpose.xlu0.b32.start.end [1/1] (short) (narrow) %v761_v41, 32  ;;  %v746_v41 = vadd.f32 %v3751_v33, %v604_v40 }
 0x32e   : > { %v751_v43 = vpop.permute.xlu1 %750  ;;  %v755_v49 = vpop.permute.xlu0 %754 }
 0x336   : > { %872 = vxpose.xlu1.b32.start.end [1/1] (short) (narrow) %v764_v42, 32 }
 0x3a9   : > { %v3127_v45 = vpop.trf.xlu1 }
 0x3aa   : > { %v3128_v47 = vunpack.i.l.bf16 %v3127_v45  ;;  %v3131_v60 = vunpack.i.h.bf16 %v3127_v45 }
 0x3ab   : > { %v856_v52 = vpop.trf.xlu0 }
 0x3ad   : > { %v3132_v46 = vpop.trf.xlu1 }
 0x3ae   : > { %v3133_v48 = vunpack.i.l.bf16 %v3132_v46  ;;  %v3136_v56 = vunpack.i.h.bf16 %v3132_v46 }
 0x3af   : > { %v857_v59 = vpop.trf.xlu0 }
 0x3b0   : > { %v2913_v50 = vpack.c.bf16 %v3133_v48, %v3128_v47  ;;  %v2919_v63 = vpack.c.bf16 %v3136_v56, %v3131_v60  ;;  %v2925_v6 = vpack.c.bf16 %v857_v59, %v856_v52 }
 0x3b1   : > { %v3137_v51 = vpop.trf.xlu1 }
 0x3b2   : > { %2914 = vmatpush3.bf16.msra.mxu1 %v2913_v50  ;;  %v3138_v54 = vunpack.i.l.bf16 %v3137_v51  ;;  %v3141_v1 = vunpack.i.h.bf16 %v3137_v51 }
 0x3b3   : > { %2915 = vmatprep.subr.bf16.mxu1 %v3400_v5  ;;  %v858_v2 = vpop.trf.xlu0 }
 0x3b5   : > { %v3142_v53 = vpop.trf.xlu1 }
 0x3b6   : > { %v3143_v55 = vunpack.i.l.bf16 %v3142_v53  ;;  %v3146_v62 = vunpack.i.h.bf16 %v3142_v53 }
 0x3b7   : > { %v859_v7 = vpop.trf.xlu0 }
 0x3b8   : > { %v2916_v58 = vpack.c.bf16 %v3143_v55, %v3138_v54  ;;  %v2922_v3 = vpack.c.bf16 %v3146_v62, %v3141_v1  ;;  %v2928_v9 = vpack.c.bf16 %v859_v7, %v858_v2 }
 0x3b9   : > { %v888_v61 = vpop.trf.xlu1 }
 0x3ba   : > { %2917 = vmatpush3.bf16.msra.mxu1 %v2916_v58 }
 0x3bb   : > { %2918 = vmatprep.subr.bf16.mxu1 %v3400_v5 }
 0x3bd   : > { %2754 = vmatmul.mubr.msk.f32.vlgmr.msra.gmra.mrb[2].mxu1 %vm904_vm1, %v675_v38  ;;  %v889_v4 = vpop.trf.xlu1 }
 0x3be   : > { %2920 = vmatpush3.bf16.msra.mxu1 %v2919_v63  ;;  %2764 = vmatprep.mubr.msk.f32.mxu1 %vm3402_vm0, %v3401_v57  ;;  %v2931_v10 = vpack.c.bf16 %v889_v4, %v888_v61 }
 0x3bf   : > { %2921 = vmatprep.subr.bf16.mxu1 %v3400_v5 }
 0x3c1   : > { %v890_v8 = vpop.trf.xlu1 }
 0x3c2   : > { %2923 = vmatpush3.bf16.msra.mxu1 %v2922_v3 }
 0x3c3   : > { %2924 = vmatprep.subr.bf16.mxu1 %v3400_v5 }
 0x3c5   : > { %2765 = vmatmul.mubr.msk.f32.vlgmr.msra.gmra.mrb[4].mxu1 %vm904_vm1, %v751_v43  ;;  %v891_v11 = vpop.trf.xlu1 }
 0x3c6   : > { %2926 = vmatpush3.bf16.msra.mxu1 %v2925_v6  ;;  %2775 = vmatprep.mubr.msk.f32.mxu1 %vm3402_vm0, %v3401_v57  ;;  %v2934_v12 = vpack.c.bf16 %v891_v11, %v890_v8 }
 0x3c7   : > { %2927 = vmatprep.subr.bf16.mxu1 %v3400_v5 }
 0x3ca   : > { %2929 = vmatpush3.bf16.msra.mxu1 %v2928_v9 }
 0x3cb   : > { %2930 = vmatprep.subr.bf16.mxu1 %v3400_v5 }
 0x3cd   : > { %2776 = vmatmul.mubr.msk.f32.vlgmr.msra.gmra.mrb[6].mxu1 %vm904_vm1, %v753_v44 }
 0x3ce   : > { %2932 = vmatpush3.bf16.msra.mxu1 %v2931_v10  ;;  %2786 = vmatprep.mubr.msk.f32.mxu1 %vm3402_vm0, %v3401_v57 }
 0x3cf   : > { %2933 = vmatprep.subr.bf16.mxu1 %v3400_v5 }
 0x3d2   : > { %2935 = vmatpush3.bf16.msra.mxu1 %v2934_v12 }
 0x3d5   : > { %2787 = vmatmul.mubr.msk.f32.vlgmr.msra.gmra.mrb[8].mxu1 %vm904_vm1, %v755_v49 }
 0x490   : > { %v973_v14 = vpop.f32.mrb[2].mxu1 }
 0x491   : > { %v1193_v15 = vmul.f32 0.17677669, %v973_v14  ;;  %v2755_v16 = vpop.f32.mrb[3].mxu1 }
 0x493   : > { %v1204_v17 = vsel %vm1201_vm2, -100000.0, %v1193_v15 }
 0x494   : > { %v1209_v18 = vsel %vm1208_vm3, %v1204_v17, -inf }
 0x495   : > { %1210 = vmax.xlane.f32.xlu1 %v1209_v18 }
 0x498   : > { %v1045_v19 = vpop.f32.mrb[4].mxu1 }
 0x499   : > { %v1194_v20 = vmul.f32 0.17677669, %v1045_v19  ;;  %v2766_v21 = vpop.f32.mrb[5].mxu1 }
 0x49b   : > { %v1205_v22 = vsel %vm1201_vm2, -100000.0, %v1194_v20 }
 0x49c   : > { %v1212_v23 = vsel %vm1208_vm3, %v1205_v22, -inf }
 0x49d   : > { %1213 = vmax.xlane.f32.xlu0 %v1212_v23 }
 0x4a0   : > { %v1117_v24 = vpop.f32.mrb[6].mxu1 }
 0x4a1   : > { %v1195_v25 = vmul.f32 0.17677669, %v1117_v24  ;;  %v2777_v26 = vpop.f32.mrb[7].mxu1 }
 0x4a3   : > { %v1206_v31 = vsel %vm1201_vm2, -100000.0, %v1195_v25 }
 0x4a4   : > { %v1215_v32 = vsel %vm1208_vm3, %v1206_v31, -inf }
 0x4a5   : > { %1216 = vmax.xlane.f32.xlu1 %v1215_v32 }
 0x4a8   : > { %v1189_v34 = vpop.f32.mrb[8].mxu1 }
 0x4a9   : > { %v1196_v36 = vmul.f32 0.17677669, %v1189_v34  ;;  %v2788_v37 = vpop.f32.mrb[9].mxu1 }
 0x4ab   : > { %v1207_v38 = vsel %vm1201_vm2, -100000.0, %v1196_v36 }
 0x4ac   : > { %v1218_v39 = vsel %vm1208_vm3, %v1207_v38, -inf }
 0x4ad   : > { %1219 = vmax.xlane.f32.xlu1 %v1218_v39 }
 0x4b3   : > { %767 = vrot.lane.b32.xlu0 %v746_v41, %s3404_s10 }
 0x4b7   : > { %773 = vrot.lane.b32.xlu0 %v746_v41, %s3403_s8 }
 0x4be   : > { %770 = vrot.lane.b32.xlu1 %v746_v41, %s3405_s19 }
 0x522   : > { %v1211_v42 = vpop.xlane.xlu1 %1210 }
 0x523   : > { %v1221_v43 = vsub.f32 %v1204_v17, %v1211_v42 }
 0x525   : > { %v1225_v44 = vmul.f32 1.442695, %v1221_v43 }
 0x527   : > { %3149 = vpow2.f32 %v1225_v44 }
 0x52a   : > { %v1214_v45 = vpop.xlane.xlu0 %1213 }
 0x52b   : > { %v1222_v46 = vsub.f32 %v1205_v22, %v1214_v45 }
 0x52d   : > { %v1227_v47 = vmul.f32 1.442695, %v1222_v46 }
 0x52e   : > { %v768_v61 = vpop.permute.xlu0 %767 }
 0x52f   : > { %3151 = vpow2.f32 %v1227_v47 }
 0x531   : > { %v3150_v48 = vpop.eup %3149 }
 0x532   : > { %v1217_v49 = vpop.xlane.xlu1 %1216  ;;  %v1233_v29 = vsel %vm1208_vm3, %v3150_v48, 0.0  ;;  %v774_v62 = vpop.permute.xlu0 %773 }
 0x533   : > { %v1223_v50 = vsub.f32 %v1206_v31, %v1217_v49  ;;  %1234 = vadd.xlane.f32.xlu1 %v1233_v29  ;;  %v2062_v29 = vld [vmem:[#allocation7] sm:$0xff] }
 0x535   : > { %v1229_v33 = vmul.f32 1.442695, %v1223_v50  ;;  %v2063_v50 = vld [vmem:[#allocation7 + $0x8] sm:$0xff] }
 0x537   : > { %3153 = vpow2.f32 %v1229_v33  ;;  %v2064_v33 = vld [vmem:[#allocation7 + $0x10] sm:$0xff] }
 0x539   : > { %v3152_v51 = vpop.eup %3151 }
 0x53a   : > { %v1220_v52 = vpop.xlane.xlu1 %1219  ;;  %v1236_v53 = vsel %vm1208_vm3, %v3152_v51, 0.0 }
 0x53b   : > { %v1224_v54 = vsub.f32 %v1207_v38, %v1220_v52  ;;  %1237 = vadd.xlane.f32.xlu1 %v1236_v53  ;;  %v2065_v52 = vld [vmem:[#allocation7 + $0x18] sm:$0xff] }
 0x53c   : > { %v2940_v53 = vpack.c.bf16 %v2065_v52, %v2064_v33 }
 0x53d   : > { %v1231_v55 = vmul.f32 1.442695, %v1224_v54  ;;  %v2066_v54 = vld [vmem:[#allocation7 + $0x20] sm:$0xff] }
 0x53e   : > { %v771_v63 = vpop.permute.xlu1 %770 }
 0x53f   : > { %3155 = vpow2.f32 %v1231_v55  ;;  %v2067_v55 = vld [vmem:[#allocation7 + $0x28] sm:$0xff] }
 0x541   : > { %v3154_v56 = vpop.eup %3153 }
 0x542   : > { %v1239_v58 = vsel %vm1208_vm3, %v3154_v56, 0.0 }
 0x543   : > { %1240 = vadd.xlane.f32.xlu1 %v1239_v58  ;;  %v2068_v58 = vld [vmem:[#allocation7 + $0x30] sm:$0xff] }
 0x549   : > { %v3156_v59 = vpop.eup %3155 }
 0x54a   : > { %v1242_v60 = vsel %vm1208_vm3, %v3156_v59, 0.0 }
 0x54b   : > { %1243 = vadd.xlane.f32.xlu0 %v1242_v60 }
 0x576   : > { %1285 = vxpose.xlu1.b32.start.end [1/1] (short) (narrow) %v768_v61, 32  ;;  %v2070_v61 = vld [vmem:[#allocation7 + $0x40] sm:$0xff] }
 0x578   : > { %1253 = vxpose.xlu0.b32.start.end [1/1] (short) (narrow) %v746_v41, 32 }
 0x583   : > { %1349 = vxpose.xlu1.b32.start.end [1/1] (short) (narrow) %v774_v62, 32  ;;  %v2071_v62 = vld [vmem:[#allocation7 + $0x48] sm:$0xff] }
 0x585   : > { %1317 = vxpose.xlu0.b32.start.end [1/1] (short) (narrow) %v771_v63, 32  ;;  %v2949_v63 = vpack.c.bf16 %v2071_v62, %v2070_v61 }
 0x5c0   : > { %v1235_v1 = vpop.xlane.xlu1 %1234 }
 0x5c1   : > { %3157 = vrcp.f32 %v1235_v1  ;;  %v2072_v1 = vld [vmem:[#allocation7 + $0x50] sm:$0xff] }
 0x5c8   : > { %v1238_v2 = vpop.xlane.xlu1 %1237 }
 0x5c9   : > { %3159 = vrcp.f32 %v1238_v2  ;;  %v2073_v2 = vld [vmem:[#allocation7 + $0x58] sm:$0xff] }
 0x5cb   : > { %v3158_v3 = vpop.eup %3157 }
 0x5cc   : > { %v1249_v4 = vmul.f32 %v3158_v3, %v3150_v48  ;;  %v2952_v3 = vpack.c.bf16 %v2073_v2, %v2072_v1 }
 0x5ce   : > { %2789 = vmatprep.subr.msk.mxu0 %vm1208_vm3, %v1249_v4 }
 0x5cf   : > { %2790 = vmatpush3.xpose.msk.msra.mxu0 %vm1208_vm3, %v1249_v4  ;;  %v2074_v4 = vld [vmem:[#allocation7 + $0x60] sm:$0xff] }
 0x5d0   : > { %v1241_v6 = vpop.xlane.xlu1 %1240 }
 0x5d1   : > { %3161 = vrcp.f32 %v1241_v6  ;;  %v2075_v6 = vld [vmem:[#allocation7 + $0x68] sm:$0xff] }
 0x5d3   : > { %v3160_v7 = vpop.eup %3159 }
 0x5d4   : > { %v1250_v8 = vmul.f32 %v3160_v7, %v3152_v51  ;;  %v2937_v51 = vpack.c.bf16 %v2063_v50, %v2062_v29  ;;  %v2955_v7 = vpack.c.bf16 %v2075_v6, %v2074_v4  ;;  %v2593_v4 = vld [vmem:[%s3925_s6] ss:$0 sm:$0xff] }
 0x5d6   : > { %2797 = vmatprep.subr.msk.mxu1 %vm1208_vm3, %v1250_v8 }
 0x5d7   : > { %2798 = vmatpush3.xpose.msk.msra.mxu1 %vm1208_vm3, %v1250_v8  ;;  %v3406_v8 = vmov 1983009808  }
 0x5d8   : > { %v1244_v9 = vpop.xlane.xlu0 %1243 }
 0x5d9   : > { %3163 = vrcp.f32 %v1244_v9  ;;  %v1912_v9 = vunpack.c.l.s4 %v3406_v8 }
 0x5db   : > { %v3162_v10 = vpop.eup %3161 }
 0x5dc   : > { %v1251_v11 = vmul.f32 %v3162_v10, %v3154_v56  ;;  %v2943_v56 = vpack.c.bf16 %v2067_v55, %v2066_v54 }
 0x5de   : > { %2805 = vmatprep.subr.msk.mxu0 %vm1208_vm3, %v1251_v11 }
 0x5e3   : > { %v3164_v12 = vpop.eup %3163 }
 0x5e4   : > { %v1252_v13 = vmul.f32 %v3164_v12, %v3156_v59  ;;  %v2069_v59 = vld [vmem:[#allocation7 + $0x38] sm:$0xff]  ;;  %v3407_v12 = vmov 1934713408  }
 0x5e5   : > { %v2946_v60 = vpack.c.bf16 %v2069_v59, %v2068_v58 }
 0x5e6   : > { %2813 = vmatprep.subr.msk.mxu1 %vm1208_vm3, %v1252_v13 }
 0x5f6   : > { %v1301_v14 = vpop.trf.xlu1 }
 0x5f7   : > { %2799 = vmatprep.mubr.msk.f32.mxu1 %vm1208_vm3, %v1301_v14  ;;  %v1913_v14 = vunpack.c.0.s8 %v1912_v9 }
 0x5f8   : > { %v1269_v15 = vpop.trf.xlu0 }
 0x5f9   : > { %2791 = vmatprep.mubr.msk.f32.mxu0 %vm1208_vm3, %v1269_v15 }
 0x5fa   : > { %v1302_v16 = vpop.trf.xlu1 }
 0x5fb   : > { %2800 = vmatmul.mubr.msk.f32.vlgmr.msra.gmra.mrb[10].mxu1 %vm1208_vm3, %v1302_v16 }
 0x5fc   : > { %2814 = vmatpush3.xpose.msk.msra.mxu1 %vm1208_vm3, %v1252_v13  ;;  %v1270_v17 = vpop.trf.xlu0  ;;  %v1944_v13 = vunpack.c.l.s4 %v3407_v12  ;;  %v2183_v12 = vld [vmem:[#allocation8] sm:$0xff] }
 0x5fd   : > { %2792 = vmatmul.mubr.msk.f32.vlgmr.msra.gmra.mrb[2].mxu0 %vm1208_vm3, %v1270_v17  ;;  %v1916_v17 = vsub.s32 %v1913_v14, %v3739_v27  ;;  %v2185_v14 = vld [vmem:[#allocation8 + $0x10] sm:$0xff] }
 0x5fe   : > { %2806 = vmatpush3.xpose.msk.msra.mxu0 %vm1208_vm3, %v1251_v11  ;;  %v1303_v18 = vpop.trf.xlu1  ;;  %v1945_v16 = vunpack.c.0.s8 %v1944_v13 }
 0x5ff   : > { %2802 = vmatprep.mubr.msk.f32.mxu1 %vm1208_vm3, %v1303_v18  ;;  %2936 = vmatprep.subr.bf16.mxu0 %v3400_v5 }
 0x600   : > { %v1271_v19 = vpop.trf.xlu0 }
 0x601   : > { %2794 = vmatprep.mubr.msk.f32.mxu0 %vm1208_vm3, %v1271_v19 }
 0x602   : > { %v1304_v20 = vpop.trf.xlu1 }
 0x603   : > { %2803 = vmatmul.mubr.msk.f32.gmra.mrb[12].mxu1 %vm1208_vm3, %v1304_v20 }
 0x604   : > { %v1272_v21 = vpop.trf.xlu0 }
 0x605   : > { %2795 = vmatmul.mubr.msk.f32.gmra.mrb[4].mxu0 %vm1208_vm3, %v1272_v21 }
 0x606   : > { %v1365_v22 = vpop.trf.xlu1 }
 0x607   : > { %2815 = vmatprep.mubr.msk.f32.mxu1 %vm1208_vm3, %v1365_v22 }
 0x608   : > { %v1333_v23 = vpop.trf.xlu0 }
 0x609   : > { %2807 = vmatprep.mubr.msk.f32.mxu0 %vm1208_vm3, %v1333_v23  ;;  %v1948_v23 = vsub.s32 %v1945_v16, %v3739_v27  ;;  %v2190_v16 = vld [vmem:[#allocation8 + $0x38] sm:$0xff] }
 0x60a   : > { %v1366_v24 = vpop.trf.xlu1 }
 0x60b   : > { %2816 = vmatmul.mubr.msk.f32.vlgmr.msra.gmra.mrb[14].mxu1 %vm1208_vm3, %v1366_v24 }
 0x60c   : > { %v1334_v25 = vpop.trf.xlu0 }
 0x60d   : > { %2808 = vmatmul.mubr.msk.f32.vlgmr.msra.gmra.mrb[6].mxu0 %vm1208_vm3, %v1334_v25 }
 0x60e   : > { %v1367_v26 = vpop.trf.xlu1  ;;  %2938 = vmatpush3.bf16.msra.mxu0 %v2937_v51 }
 0x60f   : > { %2818 = vmatprep.mubr.msk.f32.mxu1 %vm1208_vm3, %v1367_v26  ;;  %2939 = vmatprep.subr.bf16.mxu0 %v3400_v5 }
 0x610   : > { %v1335_v31 = vpop.trf.xlu0 }
 0x611   : > { %2810 = vmatprep.mubr.msk.f32.mxu0 %vm1208_vm3, %v1335_v31 }
 0x612   : > { %v1368_v32 = vpop.trf.xlu1  ;;  %2941 = vmatpush3.bf16.msra.mxu0 %v2940_v53 }
 0x613   : > { %2819 = vmatmul.mubr.msk.f32.gmra.mrb[16].mxu1 %vm1208_vm3, %v1368_v32  ;;  %2942 = vmatprep.subr.bf16.mxu0 %v3400_v5 }
 0x614   : > { %v1336_v34 = vpop.trf.xlu0  ;;  %2291 = vmatprep.mubr.f32.mxu1 %v3401_v57 }
 0x615   : > { %2811 = vmatmul.mubr.msk.f32.gmra.mrb[8].mxu0 %vm1208_vm3, %v1336_v34 }
 0x616   : > { %2853 = vmatprep.mubr.msk.f32.mxu0 %vm3402_vm0, %v3401_v57  ;;  %2944 = vmatpush3.bf16.msra.mxu0 %v2943_v56 }
 0x617   : > { %2945 = vmatprep.subr.bf16.mxu0 %v3400_v5 }
 0x61a   : > { %2947 = vmatpush3.bf16.msra.mxu0 %v2946_v60 }
 0x61b   : > { %2948 = vmatprep.subr.bf16.mxu0 %v3400_v5 }
 0x61e   : > { %2950 = vmatpush3.bf16.msra.mxu0 %v2949_v63 }
 0x61f   : > { %2951 = vmatprep.subr.bf16.mxu0 %v3400_v5 }
 0x622   : > { %2953 = vmatpush3.bf16.msra.mxu0 %v2952_v3 }
 0x623   : > { %2954 = vmatprep.subr.bf16.mxu0 %v3400_v5 }
 0x626   : > { %2956 = vmatpush3.bf16.msra.mxu0 %v2955_v7 }
 0x627   : > { %2957 = vmatprep.subr.bf16.mxu0 %v3400_v5 }
 0x6ce   : > { %v2801_v35 = vpop.f32.mrb[10].mxu1 }
 0x6cf   : > { %v1562_v36 = vpop.f32.mrb[11].mxu1 }
 0x6d0   : > { %v2793_v37 = vpop.f32.mrb[2].mxu0  ;;  %1813 = vxpose.xlu1.b32.start [1/4] (short) (narrow) %v1562_v36, 8  ;;  %v2076_v36 = vld [vmem:[#allocation7 + $0x70] sm:$0xff] }
 0x6d1   : > { %v1462_v38 = vpop.f32.mrb[3].mxu0 }
 0x6d2   : > { %1781 = vxpose.xlu0.b32.start [1/4] (short) (narrow) %v1462_v38, 8 }
 0x6d4   : > { %1814 = vxpose.xlu1.b32.cont [2/4] (short) (narrow) %v2801_v35, 8 }
 0x6d6   : > { %1782 = vxpose.xlu0.b32.cont [2/4] (short) (narrow) %v2793_v37, 8  ;;  %v2804_v39 = vpop.f32.mrb[12].mxu1  ;;  %v2077_v37 = vld [vmem:[#allocation7 + $0x78] sm:$0xff] }
 0x6d7   : > { %v1572_v40 = vpop.f32.mrb[13].mxu1 }
 0x6d8   : > { %v2796_v41 = vpop.f32.mrb[4].mxu0  ;;  %1815 = vxpose.xlu1.b32.cont [3/4] (short) (narrow) %v1572_v40, 8 }
 0x6d9   : > { %v1472_v42 = vpop.f32.mrb[5].mxu0 }
 0x6da   : > { %1783 = vxpose.xlu0.b32.cont [3/4] (short) (narrow) %v1472_v42, 8  ;;  %v2958_v42 = vpack.c.bf16 %v2077_v37, %v2076_v36  ;;  %v2198_v36 = vld [vmem:[#allocation8 + $0x78] sm:$0xff] }
 0x6dc   : > { %1816 = vxpose.xlu1.b32.end [4/4] (short) (narrow) %v2804_v39, 8  ;;  %2959 = vmatpush3.bf16.msra.mxu0 %v2958_v42  ;;  %v2202_v42 = vld [vmem:[#allocation8 + $0x98] sm:$0xff] }
 0x6de   : > { %1784 = vxpose.xlu0.b32.end [4/4] (short) (narrow) %v2796_v41, 8  ;;  %v2817_v43 = vpop.f32.mrb[14].mxu1 }
 0x6df   : > { %v1762_v44 = vpop.f32.mrb[15].mxu1 }
 0x6e0   : > { %v2809_v45 = vpop.f32.mrb[6].mxu0  ;;  %1877 = vxpose.xlu1.b32.start [1/4] (short) (narrow) %v1762_v44, 8 }
 0x6e1   : > { %v1662_v57 = vpop.f32.mrb[7].mxu0 }
 0x6e2   : > { %1845 = vxpose.xlu0.b32.start [1/4] (short) (narrow) %v1662_v57, 8 }
 0x6e4   : > { %1878 = vxpose.xlu1.b32.cont [2/4] (short) (narrow) %v2817_v43, 8 }
 0x6e6   : > { %1846 = vxpose.xlu0.b32.cont [2/4] (short) (narrow) %v2809_v45, 8  ;;  %v2820_v46 = vpop.f32.mrb[16].mxu1 }
 0x6e7   : > { %v1772_v47 = vpop.f32.mrb[17].mxu1 }
 0x6e8   : > { %v2812_v48 = vpop.f32.mrb[8].mxu0  ;;  %1879 = vxpose.xlu1.b32.cont [3/4] (short) (narrow) %v1772_v47, 8 }
 0x6e9   : > { %v1672_v49 = vpop.f32.mrb[9].mxu0 }
 0x6ea   : > { %1847 = vxpose.xlu0.b32.cont [3/4] (short) (narrow) %v1672_v49, 8 }
 0x6ec   : > { %1880 = vxpose.xlu1.b32.end [4/4] (short) (narrow) %v2820_v46, 8 }
 0x6ee   : > { %1848 = vxpose.xlu0.b32.end [4/4] (short) (narrow) %v2812_v48, 8 }
 0x750   : > { %v1829_v10 = vpop.trf.xlu1 }
 0x752   : > { %v1797_v11 = vpop.trf.xlu0 }
 0x760   : > { %v1893_v15 = vpop.trf.xlu1 }
 0x761   : > { %v1925_v18 = vcombine.low %v1829_v10, %v1893_v15  ;;  %v1926_v19 = vcombine.high %v1829_v10, %v1893_v15  ;;  %v2184_v10 = vld [vmem:[#allocation8 + $0x8] sm:$0xff] }
 0x762   : > { %v1861_v20 = vpop.trf.xlu0  ;;  %v2188_v15 = vld [vmem:[#allocation8 + $0x28] sm:$0xff] }
 0x763   : > { %v1909_v21 = vcombine.low %v1797_v11, %v1861_v20  ;;  %v1910_v22 = vcombine.high %v1797_v11, %v1861_v20  ;;  %v1933_v24 = vrot.slane %v1925_v18, %v1916_v17  ;;  %v1940_v5 = vrot.slane %v1926_v19, %v1916_v17  ;;  %v2186_v11 = vld [vmem:[#allocation8 + $0x18] sm:$0xff]  ;;  %v2187_v19 = vld [vmem:[#allocation8 + $0x20] sm:$0xff]  ;;  %v2189_v20 = vld [vmem:[#allocation8 + $0x30] sm:$0xff] }
 0x764   : > { %v2960_v13 = vpack.c.bf16 %v2186_v11, %v2184_v10  ;;  %v2964_v18 = vpack.c.bf16 %v2190_v16, %v2188_v15 }
 0x765   : > { %v1917_v25 = vrot.slane %v1909_v21, %v1916_v17  ;;  %v1924_v26 = vrot.slane %v1910_v22, %v1916_v17  ;;  %v2192_v21 = vld [vmem:[#allocation8 + $0x48] sm:$0xff]  ;;  %v2194_v22 = vld [vmem:[#allocation8 + $0x58] sm:$0xff] }
 0x766   : > { %2961 = vmatprep.subr.bf16.mxu1 %v2960_v13 }
 0x767   : > { %v1941_v31 = vcombine.low %v1917_v25, %v1933_v24  ;;  %v1942_v32 = vcombine.high %v1917_v25, %v1933_v24  ;;  %v1957_v34 = vcombine.low %v1924_v26, %v1940_v5  ;;  %v1958_v35 = vcombine.high %v1924_v26, %v1940_v5  ;;  %v2191_v24 = vld [vmem:[#allocation8 + $0x40] sm:$0xff]  ;;  %v2193_v5 = vld [vmem:[#allocation8 + $0x50] sm:$0xff] }
 0x768   : > { %v2970_v25 = vpack.c.bf16 %v2193_v5, %v2191_v24  ;;  %v2320_v5 = vld [vmem:[#allocation10 + $0x20] sm:$0xff] }
 0x769   : > { %v1949_v38 = vrot.slane %v1941_v31, %v1948_v23  ;;  %v1956_v39 = vrot.slane %v1942_v32, %v1948_v23  ;;  %v1965_v40 = vrot.slane %v1957_v34, %v1948_v23  ;;  %v1972_v41 = vrot.slane %v1958_v35, %v1948_v23  ;;  %v2196_v35 = vld [vmem:[#allocation8 + $0x68] sm:$0xff] }
 0x76a   : > { %v2972_v37 = vpack.c.bf16 %v2198_v36, %v2196_v35  ;;  %v2322_v35 = vld [vmem:[#allocation10 + $0x30] sm:$0xff]  ;;  %v2323_v36 = vld [vmem:[#allocation10 + $0x38] sm:$0xff] }
 0x76b   : > { %v1977_v43 = vcombine.low %v1949_v38, %v1956_v39  ;;  %v2591_v44 = vcombine.high %v1949_v38, %v1956_v39  ;;  %v1993_v45 = vcombine.low %v1965_v40, %v1972_v41  ;;  %v2592_v57 = vcombine.high %v1965_v40, %v1972_v41  ;;  %v2195_v38 = vld [vmem:[#allocation8 + $0x60] sm:$0xff]  ;;  %v2197_v39 = vld [vmem:[#allocation8 + $0x70] sm:$0xff]  ;;  %v2200_v41 = vld [vmem:[#allocation8 + $0x88] sm:$0xff] }
 0x76c   : > { %v2974_v40 = vpack.c.bf16 %v2197_v39, %v2195_v38  ;;  %v2340_v38 = vld [vmem:[#allocation10 + $0xc0] sm:$0xff]  ;;  %v2341_v39 = vld [vmem:[#allocation10 + $0xc8] sm:$0xff] }
 0x76d   : > { %v1984_v46 = vrot.slane %v1977_v43, %v1916_v17  ;;  %v1992_v47 = vrot.slane %v2591_v44, %v1916_v17  ;;  %v2000_v48 = vrot.slane %v1993_v45, %v1916_v17  ;;  %v2008_v49 = vrot.slane %v2592_v57, %v1916_v17  ;;  %v2199_v44 = vld [vmem:[#allocation8 + $0x80] sm:$0xff]  ;;  %v2201_v45 = vld [vmem:[#allocation8 + $0x90] sm:$0xff] }
 0x76e   : > { %v2962_v17 = vpack.c.bf16 %v2185_v14, %v2183_v12  ;;  %v2976_v43 = vpack.c.bf16 %v2202_v42, %v2200_v41  ;;  %v2978_v57 = vpack.c.bf16 %v2201_v45, %v2199_v44  ;;  %v2594_v12 = vld [vmem:[%s3958_s17] ss:$0 sm:$0xff]  ;;  %v2324_v41 = vld [vmem:[#allocation10 + $0x40] sm:$0xff]  ;;  %v2325_v42 = vld [vmem:[#allocation10 + $0x48] sm:$0xff]  ;;  %s2441_s17 = sshll.u32 %s513_s15, 4  ;;  %s3877_s17 = int_to_ptr.vmem [resolvable:$true] %s2441_s17 }
 0x76f   : > { %v2010_v29 = vcombine.high %v1984_v46, %v1992_v47  ;;  %v2026_v50 = vcombine.high %v2000_v48, %v2008_v49  ;;  %v2009_v33 = vcombine.low %v1984_v46, %v1992_v47  ;;  %v2025_v51 = vcombine.low %v2000_v48, %v2008_v49  ;;  %v2204_v46 = vld [vmem:[#allocation8 + $0xa8] sm:$0xff]  ;;  %v2206_v47 = vld [vmem:[#allocation8 + $0xb8] sm:$0xff]  ;;  %v2203_v49 = vld [vmem:[#allocation8 + $0xa0] sm:$0xff]  ;;  %p3320_p10 = scmp.lt.s32.totalorder %s3877_s17, %s3318_s30 }
 0x770   : > { %2963 = vmatpush1.bf16.msra.mxu1 %v2962_v17  ;;  %v2980_v48 = vpack.c.bf16 %v2206_v47, %v2204_v46  ;;  %v2595_v14 = vld [vmem:[%s3959_s12] ss:$0 sm:$0xff]  ;;  %v3010_v44 = vpack.c.bf16 %v2325_v42, %v2324_v41  ;;  %v2343_v45 = vld [vmem:[#allocation10 + $0xd8] sm:$0xff]  ;;  %s3962_s12 = sld [smem:[#allocation21_spill]] }
 0x771   : > { %v2024_v52 = vrot.slane %v2010_v29, %v1948_v23  ;;  %v2040_v53 = vrot.slane %v2026_v50, %v1948_v23  ;;  %v2017_v54 = vrot.slane %v2009_v33, %v1948_v23  ;;  %v2033_v55 = vrot.slane %v2025_v51, %v1948_v23  ;;  %2965 = vmatprep.subr.bf16.mxu1 %v2964_v18  ;;  %v2205_v29 = vld [vmem:[#allocation8 + $0xb0] sm:$0xff]  ;;  %v2208_v33 = vld [vmem:[#allocation8 + $0xc8] sm:$0xff]  ;;  %v2210_v51 = vld [vmem:[#allocation8 + $0xd8] sm:$0xff] }
 0x772   : > { %v2966_v23 = vpack.c.bf16 %v2189_v20, %v2187_v19  ;;  %v2982_v50 = vpack.c.bf16 %v2205_v29, %v2203_v49  ;;  %v2334_v17 = vld [vmem:[#allocation10 + $0x90] sm:$0xff]  ;;  %v2335_v18 = vld [vmem:[#allocation10 + $0x98] sm:$0xff]  ;;  %v2345_v49 = vld [vmem:[#allocation10 + $0xe8] sm:$0xff] }
 0x773   : > { %v2043_v56 = vcombine.low %v2024_v52, %v2040_v53  ;;  %v2042_v58 = vcombine.high %v2017_v54, %v2033_v55  ;;  %v2041_v59 = vcombine.low %v2017_v54, %v2033_v55  ;;  %v2044_v60 = vcombine.high %v2024_v52, %v2040_v53  ;;  %v2207_v53 = vld [vmem:[#allocation8 + $0xc0] sm:$0xff]  ;;  %v2209_v54 = vld [vmem:[#allocation8 + $0xd0] sm:$0xff]  ;;  %v2327_v46 = vld [vmem:[#allocation10 + $0x58] sm:$0xff] }
 0x774   : > { %2967 = vmatpush1.bf16.msra.mxu1 %v2966_v23  ;;  %v2984_v52 = vpack.c.bf16 %v2210_v51, %v2208_v33  ;;  %v2986_v55 = vpack.c.bf16 %v2209_v54, %v2207_v53  ;;  %v2996_v19 = vpack.c.bf16 %v2335_v18, %v2334_v17  ;;  %v2318_v20 = vld [vmem:[#allocation10 + $0x10] sm:$0xff]  ;;  %v2336_v23 = vld [vmem:[#allocation10 + $0xa0] sm:$0xff]  ;;  %v2329_v51 = vld [vmem:[#allocation10 + $0x68] sm:$0xff] }
 0x775   : > { %2050 = vrot.lane.b32.xlu1 %v2043_v56, %s3405_s19  ;;  %2046 = vrot.lane.b32.xlu0 %v2042_v58, %s3403_s8  ;;  %v2212_v56 = vld [vmem:[#allocation8 + $0xe8] sm:$0xff]  ;;  %v2214_v58 = vld [vmem:[#allocation8 + $0xf8] sm:$0xff]  ;;  %v2328_v33 = vld [vmem:[#allocation10 + $0x60] sm:$0xff]  ;;  %s2428_s8 = scalar_lea.sflag [#allocation4], %s3691_s3  ;;  %s3319_s19 = scalar_lea.vmem %s3318_s30, 256 }
 0x776   : > { %v2347_v53 = vld [vmem:[#allocation10 + $0xf8] sm:$0xff]  ;;  %v3018_v54 = vpack.c.bf16 %v2329_v51, %v2328_v33  ;;  %s3875_s13 = scalar_lea.hbm %s3962_s12, %s2598_s20 }
 0x779   : > { %2054 = vrot.lane.b32.xlu1 %v2044_v60, %s3404_s10  ;;  %v2211_v60 = vld [vmem:[#allocation8 + $0xe0] sm:$0xff]  ;;  %s3960_s10 = sld [smem:[#allocation19_spill]] }
 0x7e7   : > { %v2051_v61 = vpop.permute.xlu1 %2050  ;;  %v2047_v62 = vpop.permute.xlu0 %2046 }
 0x7e8   : > { %v2057_v63 = vsel %vm904_vm1, %v2041_v59, %v2047_v62  ;;  %v2988_v59 = vpack.c.bf16 %v2214_v58, %v2212_v56  ;;  %v2330_v56 = vld [vmem:[#allocation10 + $0x70] sm:$0xff]  ;;  %v2331_v58 = vld [vmem:[#allocation10 + $0x78] sm:$0xff] }
 0x7e9   : > { %v2059_v2 = vsel %vm2058_vm4, %v2057_v63, %v2051_v61  ;;  %v2213_v61 = vld [vmem:[#allocation8 + $0xf0] sm:$0xff]  ;;  %v2332_v63 = vld [vmem:[#allocation10 + $0x80] sm:$0xff] }
 0x7ea   : > { %v2990_v62 = vpack.c.bf16 %v2213_v61, %v2211_v60  ;;  %v2215_v60 = vld [vmem:[%s3960_s10] sm:$0x3]  ;;  %s3313_s10 = scalar_lea.vmem %s3877_s17, 128 }
 0x7eb   : > { %v2055_v1 = vpop.permute.xlu1 %2054  ;;  %v2220_v61 = vrot.slane %v2215_v60, %v595_v30  ;;  %p3314_p6 = scmp.ne.s32.totalorder %s3877_s17, %s3313_s10  ;;  %p3321_p1 = scmp.lt.s32.totalorder %s3319_s19, %s3313_s10 }
 0x7ec   : > { %v2061_v3 = vsel %vm2060_vm5, %v2059_v2, %v2055_v1  ;;  %v2333_v1 = vld [vmem:[#allocation10 + $0x88] sm:$0xff]  ;;  %v2316_v2 = vld [vmem:[#allocation10] sm:$0xff] }
 0x7ed   : > { %2854 = vmatmul.mubr.f32.vlgmr.msra.gmra.mrb[10].mxu0 %v2061_v3  ;;  %v2992_v3 = vpack.c.bf16 %v2333_v1, %v2332_v63  ;;  %p3315_p2 = pnand %p3314_p6, %p3963_p0  ;;  %p3322_p11 = por %p3321_p1, %p3320_p10 }
 0x7ef   : > { %2993 = vmatprep.subr.bf16.mxu0 %v2992_v3  ;;  %p3316_p5 = pneg %p3315_p2 }
 0x7f1   : > { %p3323_p12 = pnand %p3322_p11, %p3316_p5 }
 0x8c0   : > { %v2151_v6 = vpop.f32.mrb[10].mxu0 }
 0x8c1   : > { %v2152_v7 = vadd.f32 %v2593_v4, %v2151_v6  ;;  %v2855_v8 = vpop.f32.mrb[11].mxu0  ;;  %v2317_v4 = vld [vmem:[#allocation10 + $0x8] sm:$0xff] }
 0x8c2   : > { %v2994_v6 = vpack.c.bf16 %v2317_v4, %v2316_v2 }
 0x8c3   : > { %v3848_v9 = vadd.f32 %v2152_v7, %v3709_v0  ;;  %v2968_v0 = vpack.c.bf16 %v2194_v22, %v2192_v21  ;;  %v2319_v21 = vld [vmem:[#allocation10 + $0x18] sm:$0xff] }
 0x8c4   : > { %2995 = vmatpush3.bf16.msra.mxu0 %v2994_v6  ;;  %v2998_v22 = vpack.c.bf16 %v2319_v21, %v2318_v20 }
 0x8c5   : > { %2158 = vadd.xlane.f32.xlu0 %v3848_v9  ;;  %2969 = vmatprep.subr.bf16.mxu1 %v2968_v0  ;;  %v2337_v0 = vld [vmem:[#allocation10 + $0xa8] sm:$0xff] }
 0x8c6   : > { %2971 = vmatpush1.bf16.msra.mxu1 %v2970_v25  ;;  %2997 = vmatprep.subr.bf16.mxu0 %v2996_v19  ;;  %v3000_v24 = vpack.c.bf16 %v2337_v0, %v2336_v23  ;;  %v2321_v25 = vld [vmem:[#allocation10 + $0x28] sm:$0xff] }
 0x8c7   : > { %2973 = vmatprep.subr.bf16.mxu1 %v2972_v37  ;;  %v3006_v37 = vpack.c.bf16 %v2323_v36, %v2322_v35 }
 0x8c8   : > { %2999 = vmatpush3.bf16.msra.mxu0 %v2998_v22  ;;  %v2596_v22 = vld [vmem:[%s3961_s24] ss:$0 sm:$0xff] }
 0x8c9   : > { %3001 = vmatprep.subr.bf16.mxu0 %v3000_v24 }
 0x8ca   : > { %2975 = vmatpush1.bf16.msra.mxu1 %v2974_v40  ;;  %v3008_v40 = vpack.c.bf16 %v2341_v39, %v2340_v38 }
 0x8cb   : > { %2977 = vmatprep.subr.bf16.mxu1 %v2976_v43  ;;  %v2342_v43 = vld [vmem:[#allocation10 + $0xd0] sm:$0xff] }
 0x8cc   : > { %v3012_v47 = vpack.c.bf16 %v2343_v45, %v2342_v43 }
 0x8ce   : > { %2979 = vmatpush1.bf16.msra.mxu1 %v2978_v57  ;;  %v2326_v57 = vld [vmem:[#allocation10 + $0x50] sm:$0xff] }
 0x8cf   : > { %2981 = vmatprep.subr.bf16.mxu1 %v2980_v48  ;;  %v2344_v48 = vld [vmem:[#allocation10 + $0xe0] sm:$0xff]  ;;  %v3014_v29 = vpack.c.bf16 %v2327_v46, %v2326_v57 }
 0x8d2   : > { %2983 = vmatpush1.bf16.msra.mxu1 %v2982_v50  ;;  %v3016_v50 = vpack.c.bf16 %v2345_v49, %v2344_v48 }
 0x8d3   : > { %2985 = vmatprep.subr.bf16.mxu1 %v2984_v52  ;;  %v2346_v52 = vld [vmem:[#allocation10 + $0xf0] sm:$0xff] }
 0x8d6   : > { %2987 = vmatpush1.bf16.msra.mxu1 %v2986_v55  ;;  %v3020_v55 = vpack.c.bf16 %v2347_v53, %v2346_v52 }
 0x8d7   : > { %2989 = vmatprep.subr.bf16.mxu1 %v2988_v59  ;;  %v3022_v59 = vpack.c.bf16 %v2331_v58, %v2330_v56 }
 0x8da   : > { %2991 = vmatpush1.bf16.msra.mxu1 %v2990_v62  ;;  %v2224_v62 = vrot.slane %v2215_v60, %v599_v28 }
 0x952   : > { %v2159_v26 = vpop.xlane.xlu0 %2158 }
 0x953   : > { %v2160_v31 = vmul.f32 0.0078125, %v2159_v26  ;;  %v3002_v26 = vpack.c.bf16 %v2321_v25, %v2320_v5 }
 0x955   : > { %v2161_v32 = vsub.f32 %v3848_v9, %v2160_v31  ;;  %3003 = vmatpush3.bf16.msra.mxu0 %v3002_v26  ;;  %v2338_v31 = vld [vmem:[#allocation10 + $0xb0] sm:$0xff] }
 0x957   : > { %v2162_v34 = vmul.f32 %v2161_v32, %v2161_v32 }
 0x959   : > { %2163 = vadd.xlane.f32.xlu1 %v2162_v34 }
 0x9e6   : > { %v2164_v7 = vpop.xlane.xlu1 %2163 }
 0x9e7   : > { %v2165_v8 = vmul.f32 0.0078125, %v2164_v7 }
 0x9e9   : > { %v2166_v10 = vadd.f32 1e-05, %v2165_v8 }
 0x9eb   : > { %3165 = vrsqrt.f32 %v2166_v10 }
 0x9f5   : > { %v3166_v11 = vpop.eup %3165 }
 0x9f6   : > { %v2168_v13 = vmul.f32 %v3166_v11, %v2161_v32  ;;  %v2339_v32 = vld [vmem:[#allocation10 + $0xb8] sm:$0xff] }
 0x9f7   : > { %v3004_v34 = vpack.c.bf16 %v2339_v32, %v2338_v31 }
 0x9f8   : > { %v2175_v15 = vmul.f32 %v2594_v12, %v2168_v13 }
 0x9f9   : > { %3005 = vmatprep.subr.bf16.mxu0 %v3004_v34 }
 0x9fa   : > { %v2182_v16 = vadd.f32 %v2595_v14, %v2175_v15  ;;  %3007 = vmatpush3.bf16.msra.mxu0 %v3006_v37 }
 0x9fb   : > { %3009 = vmatprep.subr.bf16.mxu0 %v3008_v40 }
 0x9fc   : > { %2292 = vmatmul.mubr.f32.vlgmr.msra.gmra.mrb[18].mxu1 %v2182_v16 }
 0x9fe   : > { %3011 = vmatpush3.bf16.msra.mxu0 %v3010_v44 }
 0x9ff   : > { %3013 = vmatprep.subr.bf16.mxu0 %v3012_v47 }
 0xa02   : > { %3015 = vmatpush3.bf16.msra.mxu0 %v3014_v29 }
 0xa03   : > { %3017 = vmatprep.subr.bf16.mxu0 %v3016_v50 }
 0xa06   : > { %3019 = vmatpush3.bf16.msra.mxu0 %v3018_v54 }
 0xa07   : > { %3021 = vmatprep.subr.bf16.mxu0 %v3020_v55 }
 0xa0a   : > { %3023 = vmatpush3.bf16.msra.mxu0 %v3022_v59 }
 0xacf   : > { %v2293_v63 = vpop.f32.mrb[18].mxu1 }
 0xad0   : > { %v2294_v1 = vadd.f32 %v2293_v63, %v2220_v61  ;;  %v2295_v2 = vpop.f32.mrb[19].mxu1 }
 0xad1   : > { %v2296_v3 = vadd.f32 %v2295_v2, %v2224_v62 }
 0xad2   : > { %v2300_v4 = vmul.f32 %v2294_v1, %v2294_v1  ;;  %v2298_v18 = vmul.f32 0.5, %v2294_v1 }
 0xad3   : > { %v2301_v6 = vmul.f32 %v2296_v3, %v2296_v3  ;;  %v2299_v16 = vmul.f32 0.5, %v2296_v3 }
 0xad4   : > { %v2302_v7 = vmul.f32 %v2300_v4, %v2294_v1 }
 0xad5   : > { %v2303_v8 = vmul.f32 %v2301_v6, %v2296_v3 }
 0xad6   : > { %v2304_v10 = vmul.f32 0.044715, %v2302_v7 }
 0xad7   : > { %v2305_v11 = vmul.f32 0.044715, %v2303_v8 }
 0xad8   : > { %v2306_v12 = vadd.f32 %v2304_v10, %v2294_v1 }
 0xad9   : > { %v2307_v13 = vadd.f32 %v2305_v11, %v2296_v3 }
 0xada   : > { %v2308_v14 = vmul.f32 0.7978846, %v2306_v12 }
 0xadb   : > { %v2309_v15 = vmul.f32 0.7978846, %v2307_v13 }
 0xadc   : > { %3167 = vtanh.f32 %v2308_v14 }
 0xadd   : > { %3169 = vtanh.f32 %v2309_v15 }
 0xae6   : > { %v3168_v27 = vpop.eup %3167 }
 0xae7   : > { %v3170_v28 = vpop.eup %3169  ;;  %v2312_v30 = vadd.f32 1.0, %v3168_v27 }
 0xae8   : > { %v2313_v17 = vadd.f32 1.0, %v3170_v28 }
 0xae9   : > { %v2314_v20 = vmul.f32 %v2312_v30, %v2298_v18 }
 0xaea   : > { %v2315_v19 = vmul.f32 %v2313_v17, %v2299_v16 }
 0xaec   : > { %2419 = vmatprep.mubr.f32.mxu0 %v2315_v19 }
 0xaed   : > { %2420 = vmatmul.mubr.f32.vlgmr.msra.gmra.mrb[12].mxu0 %v2314_v20 }
 0xbc0   : > { %v2707_v21 = vpop.f32.mrb[12].mxu0 }
 0xbc1   : > { %v2708_v23 = vpop.f32.mrb[13].mxu0 }
 0xbc2   : > { %v2709_v0 = vadd.f32 %v2708_v23, %v2707_v21 }
 0xbc4   : > { %v2422_v24 = vadd.f32 %v2709_v0, %v2596_v22 }
 0xbc6   : > { %v2425_v5 = vadd.f32 %v2422_v24, %v3848_v9 }
 0xbc8   : > { %2426 = vst [vmem:[%s513_s15] sm:$0xff] %v2425_v5 }
 0xbc9   : > { %3326 = shalt.err (!%p3323_p12)
}
 0xbca   : > { %s3327_s3 = scalar_lea.hbm %s3875_s13, 128  ;;  %s3331_s20 = scalar_lea.hbm %s3962_s12, 256 }
 0xbcb   : > { %p3328_p13 = scmp.ne.s32.totalorder %s3875_s13, %s3327_s3  ;;  %p3332_p9 = scmp.lt.u32.totalorder %s3875_s13, %s3962_s12 }
 0xbcc   : > { %p3333_p4 = scmp.lt.u32.totalorder %s3331_s20, %s3327_s3  ;;  %p3335_p6 = scmp.lt.u32.totalorder %s3327_s3, %s3875_s13 }
 0xbcd   : > { %p3329_p3 = pnand %p3328_p13, %p3963_p0 }
 0xbce   : > { %p3334_p8 = por %p3333_p4, %p3332_p9 }
 0xbcf   : > { %p3330_p7 = pneg %p3329_p3 }
 0xbd0   : > { %p3336_p2 = por %p3335_p6, %p3334_p8 }
 0xbd2   : > { %p3337_p5 = pnand %p3336_p2, %p3330_p7 }
 0xbd4   : > { %3340 = shalt.err (!%p3337_p5)
}
 0xbd5   : > { %3042 = dma.vmem_to_hbm [thread:$0]  (%p3963_p0), %s3877_s17, 128, %s3875_s13, %s2428_s8  }
 0xbd6 PF: > { %s2453_s16 = sand.u32 1, %s3375_s25   ;;  %p3964_p10 = scmp.ne.s32.totalorder %s3951_s29, 0 }
 0xbd7   : > { %p3965_p1 = scmp.ge.s32.totalorder %s3387_s28, 2  ;;  %s2454_s10 = scalar_lea.sflag [#allocation4], %s2453_s16 }
 0xbd9   : > { %p3062_p11 = pnand %p3965_p1, %p3964_p10 }
 0xbdb   : > { %3370 = dma.done.wait (!%p3062_p11), %s2454_s10, 128  }
 0xbdc   : > { %3372 = vsyncadd (!%p3062_p11), %s2454_s10, 4294967168  ;;  %p28_p12 = scmp.ge.s32.totalorder %s3615_s18, 4   ;;  %s3966_s25 = smov %s3379_s26 }
 0xbdd   : > { %s3967_s26 = smov %s3383_s27  ;;  %s3968_s27 = smov %s3626_s23 }
 0xbde   : > { %s3969_s28 = smov %s3615_s18  ;;  %30 = sbr.rel (!%p28_p12) target bundleno = 14 (0xe), region = 133 }
 0xbe5   :  { %2459 = vsyncpa [#allocation3], 1 }
 0xbe6   :  { %2461 = vsyncpa [#allocation3 + $0x1], 1 }
 0xbe7   :  { %2462 = vsyncpa [#allocation6], 1 }
 0xbe8   :  { %2463 = vsyncpa [#allocation9], 1 }
 0xbe9   :  { %2464 = vsyncpa [#allocation4], 1 }
 0xbea   :  { %2466 = vsyncpa [#allocation4 + $0x1], 1 }

</bundles_post_ra>
